<compile_context>
chip_gen: v6e
topology: v6e:2x2x1
jax: 0.10.0
libtpu: 0.0.40
codegen_flags: <defaults>
</compile_context>

<pallas_src>
import functools

import jax
import jax.numpy as jnp
from jax import lax
from jax.experimental import pallas as pl
from jax.experimental.pallas import tpu as pltpu


def _round_up(x, m):
    return ((x + m - 1) // m) * m


def _vmem_limit_bytes():
    """Per-TC VMEM budget with headroom (review: never pin to physical cap)."""
    try:
        info = pltpu.get_tpu_info()
        cap = getattr(info, "vmem_capacity_bytes", None) or (64 * 1024 * 1024)
    except Exception:
        cap = 64 * 1024 * 1024
    return int(cap * 0.85)


def bigru_kernel(xf_ref, xb_ref, wih_ref, whh_ref, bih_ref, bhh_ref,
                 out_f_ref, out_b_ref, hfin_ref, gi_f_ref, gi_b_ref,
                 *, T, chunk_t, Bp, Hp, num_chunks, ragged):
    """One time-chunk per grid step; both GRU directions fused in one body.

    Kernel-view shapes (TCB = chunk_t * Bp):
      xf_ref:  [TCB, E]    bf16  forward direction's time chunk  (chunk c)
      xb_ref:  [TCB, E]    bf16  backward direction's time chunk (chunk C-1-c)
      wih_ref: [2, E, 3Hp] bf16  gate-padded input weights  (r|z|n lane slabs)
      whh_ref: [2, Hp, 3Hp] f32  gate-padded hidden weights
      bih_ref, bhh_ref: [2, 1, 3Hp] f32
      out_f_ref, out_b_ref: [TCB, Hp] f32  per-timestep hidden states
      hfin_ref: [2, Bp, Hp] f32  resident block: h carry across chunks + final h
      gi_f_ref, gi_b_ref: [TCB, 3Hp] f32  VMEM scratch: per-chunk input projection
    """
    c = pl.program_id(0)
    cb = num_chunks - 1 - c      # backward direction walks chunks in reverse

    # h carry lives in the resident final-hidden output block; init at chunk 0.
    @pl.when(c == 0)
    def _():
        hfin_ref[...] = jnp.zeros_like(hfin_ref)

    # ---- Phase 1: per-chunk input projections, two big bf16 MXU matmuls ----
    gi_f_ref[...] = (
        jnp.dot(xf_ref[...], wih_ref[0], preferred_element_type=jnp.float32)
        + bih_ref[0])
    gi_b_ref[...] = (
        jnp.dot(xb_ref[...], wih_ref[1], preferred_element_type=jnp.float32)
        + bih_ref[1])

    # Loop-invariant recurrence weights / bias broadcasts hoisted once.
    whh_f = whh_ref[0]
    whh_b = whh_ref[1]
    bhh_f = jnp.broadcast_to(bhh_ref[0], (Bp, 3 * Hp))
    bhh_b = jnp.broadcast_to(bhh_ref[1], (Bp, 3 * Hp))

    def gru_cell(gi, gh, h_prev):
        # Lane-aligned gate slabs (Hp is a multiple of 128) -> free slices.
        i_r, i_z, i_n = gi[:, 0:Hp], gi[:, Hp:2 * Hp], gi[:, 2 * Hp:]
        h_r, h_z, h_n = gh[:, 0:Hp], gh[:, Hp:2 * Hp], gh[:, 2 * Hp:]
        r = jax.nn.sigmoid(i_r + h_r)
        z = jax.nn.sigmoid(i_z + h_z)
        n = jnp.tanh(i_n + r * h_n)
        return (1.0 - z) * n + z * h_prev

    # ---- Phase 2: serial recurrence, fwd + bwd chains interleaved ----
    def step(s, carry):
        h_f, h_b = carry
        row_f = pl.multiple_of(s * Bp, Bp)                    # fwd local row
        row_b = pl.multiple_of((chunk_t - 1 - s) * Bp, Bp)    # bwd local row

        gi_f = gi_f_ref[pl.ds(row_f, Bp), :]
        gi_b = gi_b_ref[pl.ds(row_b, Bp), :]
        # Two independent small matmuls + nonlinearity chains; the scheduler
        # interleaves them to hide MXU/EUP latency on single-TC chips.
        gh_f = jnp.dot(h_f, whh_f, preferred_element_type=jnp.float32) + bhh_f
        gh_b = jnp.dot(h_b, whh_b, preferred_element_type=jnp.float32) + bhh_b

        hf_new = gru_cell(gi_f, gh_f, h_f)
        hb_new = gru_cell(gi_b, gh_b, h_b)

        if ragged:
            # Padded timesteps (t >= T) must not advance the hidden state.
            t_f = c * chunk_t + s
            t_b = cb * chunk_t + (chunk_t - 1 - s)
            hf_new = jnp.where(t_f < T, hf_new, h_f)
            hb_new = jnp.where(t_b < T, hb_new, h_b)

        out_f_ref[pl.ds(row_f, Bp), :] = hf_new               # lane-dense stores
        out_b_ref[pl.ds(row_b, Bp), :] = hb_new
        return hf_new, hb_new

    h_f0 = hfin_ref[0]
    h_b0 = hfin_ref[1]
    h_f_fin, h_b_fin = lax.fori_loop(0, chunk_t, step, (h_f0, h_b0),
                                     unroll=min(chunk_t, 4))
    hfin_ref[0] = h_f_fin
    hfin_ref[1] = h_b_fin


def _pack_direction(wih, whh, bih, bhh, Hp):
    """PyTorch-layout GRU params -> transposed, gate-padded lane-aligned layout."""
    H3, E = wih.shape
    H = H3 // 3
    pad = Hp - H
    wih_p = jnp.pad(wih.T.reshape(E, 3, H).astype(jnp.float32),
                    ((0, 0), (0, 0), (0, pad))).reshape(E, 3 * Hp)
    whh_p = jnp.pad(whh.T.reshape(H, 3, H).astype(jnp.float32),
                    ((0, pad), (0, 0), (0, pad))).reshape(Hp, 3 * Hp)
    bih_p = jnp.pad(bih.reshape(3, H).astype(jnp.float32),
                    ((0, 0), (0, pad))).reshape(1, 3 * Hp)
    bhh_p = jnp.pad(bhh.reshape(3, H).astype(jnp.float32),
                    ((0, 0), (0, pad))).reshape(1, 3 * Hp)
    return wih_p, whh_p, bih_p, bhh_p


def make_encoder_params(key, input_dim, emb_dim, hidden_dim):
    """Deterministic parameter init (shapes match nn.Embedding / nn.GRU)."""
    ks = jax.random.split(key, 9)
    H3 = 3 * hidden_dim
    s = 1.0 / jnp.sqrt(hidden_dim)
    return {
        "emb": jax.random.normal(ks[0], (input_dim, emb_dim), jnp.float32),
        # forward direction (l0)
        "wih_f": jax.random.uniform(ks[1], (H3, emb_dim), jnp.float32, -s, s),
        "whh_f": jax.random.uniform(ks[2], (H3, hidden_dim), jnp.float32, -s, s),
        "bih_f": jax.random.uniform(ks[3], (H3,), jnp.float32, -s, s),
        "bhh_f": jax.random.uniform(ks[4], (H3,), jnp.float32, -s, s),
        # backward direction (l0_reverse)
        "wih_b": jax.random.uniform(ks[5], (H3, emb_dim), jnp.float32, -s, s),
        "whh_b": jax.random.uniform(ks[6], (H3, hidden_dim), jnp.float32, -s, s),
        "bih_b": jax.random.uniform(ks[7], (H3,), jnp.float32, -s, s),
        "bhh_b": jax.random.uniform(ks[8], (H3,), jnp.float32, -s, s),
    }


def encoder_forward(params, token_seq, hidden_type="cat", time_chunk=64):
    """token_seq: int32 [B, T]. Returns (hidden_state, outputs) like the PyTorch module."""
    B, T = token_seq.shape
    emb = params["emb"]
    E = emb.shape[1]
    H = params["whh_f"].shape[1]
    Hp = _round_up(max(H, 128), 128)          # lane-aligned hidden size
    Bp = _round_up(max(B, 8), 8)              # sublane-aligned batch

    chunk_t = max(1, min(time_chunk, T))      # timesteps per grid step
    num_chunks = (T + chunk_t - 1) // chunk_t
    Tp = num_chunks * chunk_t
    ragged = (Tp != T)
    TCB = chunk_t * Bp

    # Embedding lookup (plain JAX gather) + time-major layout, padded batch/time.
    # TODO(synk): fold the embedding gather into the kernel (scalar-prefetch the
    # token ids + DMA row gather) to avoid the extra HBM round trip.
    embedded = jnp.take(emb, token_seq, axis=0).astype(jnp.float32)   # [B, T, E]
    x_tbe = jnp.transpose(embedded, (1, 0, 2))                        # [T, B, E]
    x_tbe = jnp.pad(x_tbe, ((0, Tp - T), (0, Bp - B), (0, 0)))        # [Tp, Bp, E]
    x2d = x_tbe.reshape(Tp * Bp, E).astype(jnp.bfloat16)              # bf16 MXU input

    wih_f, whh_f, bih_f, bhh_f = _pack_direction(
        params["wih_f"], params["whh_f"], params["bih_f"], params["bhh_f"], Hp)
    wih_b, whh_b, bih_b, bhh_b = _pack_direction(
        params["wih_b"], params["whh_b"], params["bih_b"], params["bhh_b"], Hp)
    wih = jnp.stack([wih_f, wih_b]).astype(jnp.bfloat16)   # [2, E, 3Hp]  bf16
    whh = jnp.stack([whh_f, whh_b])                        # [2, Hp, 3Hp] f32 (recurrence stays f32)
    bih = jnp.stack([bih_f, bih_b])                        # [2, 1, 3Hp]
    bhh = jnp.stack([bhh_f, bhh_b])                        # [2, 1, 3Hp]

    kernel = functools.partial(bigru_kernel, T=T, chunk_t=chunk_t, Bp=Bp, Hp=Hp,
                               num_chunks=num_chunks, ragged=ragged)

    # TODO(synk): on v7x a direction-split variant (grid=(2, num_chunks),
    # dimension_semantics=("parallel","arbitrary")) could use both TensorCores;
    # the fused single-body version below is the better choice on v5e/v6e.
    # TODO(synk): pipeline_mode=pl.Buffered(1) on the constant-index weight
    # BlockSpecs would drop their double-buffering when VMEM is tight.
    out_f, out_b, hfin = pl.pallas_call(
        kernel,
        grid=(num_chunks,),
        out_shape=(jax.ShapeDtypeStruct((Tp * Bp, Hp), jnp.float32),
                   jax.ShapeDtypeStruct((Tp * Bp, Hp), jnp.float32),
                   jax.ShapeDtypeStruct((2, Bp, Hp), jnp.float32)),
        in_specs=[
            pl.BlockSpec((TCB, E), lambda c: (c, 0)),                    # x chunk (fwd)
            pl.BlockSpec((TCB, E), lambda c: (num_chunks - 1 - c, 0)),   # x chunk (bwd)
            pl.BlockSpec((2, E, 3 * Hp), lambda c: (0, 0, 0)),           # W_ih (bf16)
            pl.BlockSpec((2, Hp, 3 * Hp), lambda c: (0, 0, 0)),          # W_hh (f32)
            pl.BlockSpec((2, 1, 3 * Hp), lambda c: (0, 0, 0)),           # b_ih
            pl.BlockSpec((2, 1, 3 * Hp), lambda c: (0, 0, 0)),           # b_hh
        ],
        out_specs=(
            pl.BlockSpec((TCB, Hp), lambda c: (c, 0)),                   # fwd outputs
            pl.BlockSpec((TCB, Hp), lambda c: (num_chunks - 1 - c, 0)),  # bwd outputs
            pl.BlockSpec((2, Bp, Hp), lambda c: (0, 0, 0)),              # final h (resident carry)
        ),
        scratch_shapes=[pltpu.VMEM((TCB, 3 * Hp), jnp.float32),
                        pltpu.VMEM((TCB, 3 * Hp), jnp.float32)],
        compiler_params=pltpu.CompilerParams(
            dimension_semantics=("arbitrary",),      # chunks carry h sequentially
            vmem_limit_bytes=_vmem_limit_bytes()),
    )(x2d, x2d, wih, whh, bih, bhh)

    # Un-pad and assemble the batch-first bidirectional outputs [B, T, 2H].
    out_f4 = out_f.reshape(Tp, Bp, Hp)[:T, :B, :H]            # [T, B, H]
    out_b4 = out_b.reshape(Tp, Bp, Hp)[:T, :B, :H]            # [T, B, H]
    outputs = jnp.concatenate(
        [jnp.transpose(out_f4, (1, 0, 2)),
         jnp.transpose(out_b4, (1, 0, 2))], axis=-1)          # [B, T, 2H]

    h_f = hfin[0, :B, :H]
    h_b = hfin[1, :B, :H]
    if hidden_type == "sum":
        hidden_state = (h_f + h_b)[None, ...]                          # [1, B, H]
    elif hidden_type == "mul":
        hidden_state = (h_f * h_b)[None, ...]                          # [1, B, H]
    else:  # "cat" and default
        hidden_state = jnp.concatenate([h_f, h_b], axis=1)[None, ...]  # [1, B, 2H]
    # TODO(synk): nn.GRU dropout is a no-op for a single-layer GRU, so it is omitted.
    return hidden_state, outputs


# ---- pure-JAX reference (same math, lax.scan) for a sanity check ----
def _gru_ref(x_tbe, wih, whh, bih, bhh):
    H = whh.shape[0] // 3
    wih_t, whh_t = wih.T, whh.T

    def step(h, x_t):
        gi = x_t @ wih_t + bih
        gh = h @ whh_t + bhh
        r = jax.nn.sigmoid(gi[:, :H] + gh[:, :H])
        z = jax.nn.sigmoid(gi[:, H:2 * H] + gh[:, H:2 * H])
        n = jnp.tanh(gi[:, 2 * H:] + r * gh[:, 2 * H:])
        h_new = (1.0 - z) * n + z * h
        return h_new, h_new

    h0 = jnp.zeros((x_tbe.shape[1], H), jnp.float32)
    h_fin, outs = lax.scan(step, h0, x_tbe)
    return outs, h_fin


def _encoder_ref(params, token_seq):
    embedded = jnp.take(params["emb"], token_seq, axis=0)
    x_tbe = jnp.transpose(embedded, (1, 0, 2))
    out_f, h_f = _gru_ref(x_tbe, params["wih_f"], params["whh_f"],
                          params["bih_f"], params["bhh_f"])
    out_b_rev, h_b = _gru_ref(x_tbe[::-1], params["wih_b"], params["whh_b"],
                              params["bih_b"], params["bhh_b"])
    out_b = out_b_rev[::-1]
    outputs = jnp.concatenate(
        [jnp.transpose(out_f, (1, 0, 2)), jnp.transpose(out_b, (1, 0, 2))], axis=-1)
    hidden_state = jnp.concatenate([h_f, h_b], axis=1)[None, ...]
    return hidden_state, outputs


if __name__ == "__main__":
    input_dim = 20     # vocab size
    emb_dim = 16
    hidden_dim = 32
    B, T = 2, 8

    key = jax.random.PRNGKey(0)
    k_par, k_tok = jax.random.split(key)
    params = make_encoder_params(k_par, input_dim, emb_dim, hidden_dim)
    token_seq = jax.random.randint(k_tok, (B, T), 0, input_dim, dtype=jnp.int32)

    h_ref, o_ref = _encoder_ref(params, token_seq)

    # Run 1: exercise the time-chunked pipeline with a ragged tail (3 chunks of 3 for T=8).
    hidden_state, outputs = encoder_forward(params, token_seq, hidden_type="cat",
                                            time_chunk=3)
    hidden_state = jax.block_until_ready(hidden_state)
    outputs = jax.block_until_ready(outputs)
    assert hidden_state.shape == (1, B, 2 * hidden_dim)
    assert outputs.shape == (B, T, 2 * hidden_dim)
    # bf16 MXU inputs for the input projection -> loosened tolerance vs f32 reference.
    assert jnp.allclose(hidden_state, h_ref, atol=2e-2, rtol=2e-2)
    assert jnp.allclose(outputs, o_ref, atol=2e-2, rtol=2e-2)

    # Run 2: default chunking (single chunk for this tiny T).
    hidden_state2, outputs2 = encoder_forward(params, token_seq, hidden_type="cat")
    hidden_state2 = jax.block_until_ready(hidden_state2)
    outputs2 = jax.block_until_ready(outputs2)
    assert jnp.allclose(hidden_state2, h_ref, atol=2e-2, rtol=2e-2)
    assert jnp.allclose(outputs2, o_ref, atol=2e-2, rtol=2e-2)

    print("KERNEL_OK")
</pallas_src>

<mosaic_0001>
module attributes {stable_mosaic.version = 11 : i64} {
  func.func @bigru_kernel(%arg0: i32, %arg1: memref<24x16xbf16, #tpu.memory_space<vmem>>, %arg2: memref<24x16xbf16, #tpu.memory_space<vmem>>, %arg3: memref<2x16x384xbf16, #tpu.memory_space<vmem>>, %arg4: memref<2x128x384xf32, #tpu.memory_space<vmem>>, %arg5: memref<2x1x384xf32, #tpu.memory_space<vmem>>, %arg6: memref<2x1x384xf32, #tpu.memory_space<vmem>>, %arg7: memref<24x128xf32, #tpu.memory_space<vmem>>, %arg8: memref<24x128xf32, #tpu.memory_space<vmem>>, %arg9: memref<2x8x128xf32, #tpu.memory_space<vmem>>, %arg10: memref<24x384xf32, #tpu.memory_space<vmem>>, %arg11: memref<24x384xf32, #tpu.memory_space<vmem>>) attributes {dimension_semantics = [#tpu.dimension_semantics<arbitrary>], iteration_bounds = array<i64: 3>, scalar_prefetch = 0 : i64, scratch_operands = 2 : i64, tpu.core_type = #tpu.core_type<tc>, window_params = [{transform_indices = @transform_0, window_bounds = array<i64: 24, 16>}, {transform_indices = @transform_1, window_bounds = array<i64: 24, 16>}, {pipeline_mode = #tpu.pipeline_mode<synchronous>, transform_indices = @transform_2, window_bounds = array<i64: 2, 16, 384>}, {pipeline_mode = #tpu.pipeline_mode<synchronous>, transform_indices = @transform_3, window_bounds = array<i64: 2, 128, 384>}, {pipeline_mode = #tpu.pipeline_mode<synchronous>, transform_indices = @transform_4, window_bounds = array<i64: 2, 1, 384>}, {pipeline_mode = #tpu.pipeline_mode<synchronous>, transform_indices = @transform_5, window_bounds = array<i64: 2, 1, 384>}, {transform_indices = @transform_6, window_bounds = array<i64: 24, 128>}, {transform_indices = @transform_7, window_bounds = array<i64: 24, 128>}, {pipeline_mode = #tpu.pipeline_mode<synchronous>, transform_indices = @transform_8, window_bounds = array<i64: 2, 8, 128>}]} {
    %c2_i32 = arith.constant 2 : i32
    %0 = arith.subi %c2_i32, %arg0 : i32
    %c0_i32 = arith.constant 0 : i32
    %1 = arith.cmpi eq, %arg0, %c0_i32 : i32
    %2 = arith.extui %1 : i1 to i32
    %c0_i32_0 = arith.constant 0 : i32
    %3 = arith.cmpi ne, %2, %c0_i32_0 : i32
    scf.if %3 {
      %cst_105 = arith.constant 0.000000e+00 : f32
      %278 = vector.broadcast %cst_105 : f32 to vector<2x8x128xf32>
      %c0_106 = arith.constant 0 : index
      %c0_107 = arith.constant 0 : index
      %c0_108 = arith.constant 0 : index
      %279 = vector.load %arg9[%c0_106, %c0_107, %c0_108] : memref<2x8x128xf32, #tpu.memory_space<vmem>>, vector<2x8x128xf32>
      tpu.vector_store %arg9[%c0_106, %c0_107, %c0_108], %278 {strides = array<i32>} : memref<2x8x128xf32, #tpu.memory_space<vmem>>, vector<2x8x128xf32>,
    } else {
    }
    %c0 = arith.constant 0 : index
    %c0_1 = arith.constant 0 : index
    %4 = vector.load %arg1[%c0, %c0_1] : memref<24x16xbf16, #tpu.memory_space<vmem>>, vector<24x16xbf16>
    %c0_2 = arith.constant 0 : index
    %c0_3 = arith.constant 0 : index
    %c0_4 = arith.constant 0 : index
    %5 = vector.load %arg3[%c0_2, %c0_3, %c0_4] : memref<2x16x384xbf16, #tpu.memory_space<vmem>>, vector<1x16x384xbf16>
    %6 = vector.shape_cast %5 : vector<1x16x384xbf16> to vector<16x384xbf16>
    %cst = arith.constant dense<0.000000e+00> : vector<24x384xf32>
    %7 = tpu.matmul %4, %6, %cst {dimension_numbers = #tpu.dot_dimension_numbers<[1], [0], [0], [1], [0, 0, 1, 1], [], []>} : vector<24x16xbf16>, vector<16x384xbf16>, vector<24x384xf32> -> vector<24x384xf32>
    %c0_5 = arith.constant 0 : index
    %c0_6 = arith.constant 0 : index
    %c0_7 = arith.constant 0 : index
    %8 = vector.load %arg5[%c0_5, %c0_6, %c0_7] : memref<2x1x384xf32, #tpu.memory_space<vmem>>, vector<1x1x384xf32>
    %9 = vector.shape_cast %8 : vector<1x1x384xf32> to vector<1x384xf32>
    %10 = vector.broadcast %9 : vector<1x384xf32> to vector<24x384xf32>
    %11 = arith.addf %7, %10 : vector<24x384xf32>
    %c0_8 = arith.constant 0 : index
    %c0_9 = arith.constant 0 : index
    %12 = vector.load %arg10[%c0_8, %c0_9] : memref<24x384xf32, #tpu.memory_space<vmem>>, vector<24x384xf32>
    tpu.vector_store %arg10[%c0_8, %c0_9], %11 {strides = array<i32>} : memref<24x384xf32, #tpu.memory_space<vmem>>, vector<24x384xf32>,
    %c0_10 = arith.constant 0 : index
    %c0_11 = arith.constant 0 : index
    %13 = vector.load %arg2[%c0_10, %c0_11] : memref<24x16xbf16, #tpu.memory_space<vmem>>, vector<24x16xbf16>
    %c1 = arith.constant 1 : index
    %c0_12 = arith.constant 0 : index
    %c0_13 = arith.constant 0 : index
    %14 = vector.load %arg3[%c1, %c0_12, %c0_13] : memref<2x16x384xbf16, #tpu.memory_space<vmem>>, vector<1x16x384xbf16>
    %15 = vector.shape_cast %14 : vector<1x16x384xbf16> to vector<16x384xbf16>
    %cst_14 = arith.constant dense<0.000000e+00> : vector<24x384xf32>
    %16 = tpu.matmul %13, %15, %cst_14 {dimension_numbers = #tpu.dot_dimension_numbers<[1], [0], [0], [1], [0, 0, 1, 1], [], []>} : vector<24x16xbf16>, vector<16x384xbf16>, vector<24x384xf32> -> vector<24x384xf32>
    %c1_15 = arith.constant 1 : index
    %c0_16 = arith.constant 0 : index
    %c0_17 = arith.constant 0 : index
    %17 = vector.load %arg5[%c1_15, %c0_16, %c0_17] : memref<2x1x384xf32, #tpu.memory_space<vmem>>, vector<1x1x384xf32>
    %18 = vector.shape_cast %17 : vector<1x1x384xf32> to vector<1x384xf32>
    %19 = vector.broadcast %18 : vector<1x384xf32> to vector<24x384xf32>
    %20 = arith.addf %16, %19 : vector<24x384xf32>
    %c0_18 = arith.constant 0 : index
    %c0_19 = arith.constant 0 : index
    %21 = vector.load %arg11[%c0_18, %c0_19] : memref<24x384xf32, #tpu.memory_space<vmem>>, vector<24x384xf32>
    tpu.vector_store %arg11[%c0_18, %c0_19], %20 {strides = array<i32>} : memref<24x384xf32, #tpu.memory_space<vmem>>, vector<24x384xf32>,
    %c0_20 = arith.constant 0 : index
    %c0_21 = arith.constant 0 : index
    %c0_22 = arith.constant 0 : index
    %22 = vector.load %arg4[%c0_20, %c0_21, %c0_22] : memref<2x128x384xf32, #tpu.memory_space<vmem>>, vector<1x128x384xf32>
    %23 = vector.shape_cast %22 : vector<1x128x384xf32> to vector<128x384xf32>
    %c1_23 = arith.constant 1 : index
    %c0_24 = arith.constant 0 : index
    %c0_25 = arith.constant 0 : index
    %24 = vector.load %arg4[%c1_23, %c0_24, %c0_25] : memref<2x128x384xf32, #tpu.memory_space<vmem>>, vector<1x128x384xf32>
    %25 = vector.shape_cast %24 : vector<1x128x384xf32> to vector<128x384xf32>
    %c0_26 = arith.constant 0 : index
    %c0_27 = arith.constant 0 : index
    %c0_28 = arith.constant 0 : index
    %26 = vector.load %arg6[%c0_26, %c0_27, %c0_28] : memref<2x1x384xf32, #tpu.memory_space<vmem>>, vector<1x1x384xf32>
    %27 = vector.shape_cast %26 : vector<1x1x384xf32> to vector<1x384xf32>
    %28 = vector.shape_cast %27 : vector<1x384xf32> to vector<1x384xf32>
    %29 = vector.broadcast %28 : vector<1x384xf32> to vector<8x384xf32>
    %c1_29 = arith.constant 1 : index
    %c0_30 = arith.constant 0 : index
    %c0_31 = arith.constant 0 : index
    %30 = vector.load %arg6[%c1_29, %c0_30, %c0_31] : memref<2x1x384xf32, #tpu.memory_space<vmem>>, vector<1x1x384xf32>
    %31 = vector.shape_cast %30 : vector<1x1x384xf32> to vector<1x384xf32>
    %32 = vector.shape_cast %31 : vector<1x384xf32> to vector<1x384xf32>
    %33 = vector.broadcast %32 : vector<1x384xf32> to vector<8x384xf32>
    %c0_32 = arith.constant 0 : index
    %c0_33 = arith.constant 0 : index
    %c0_34 = arith.constant 0 : index
    %34 = vector.load %arg9[%c0_32, %c0_33, %c0_34] : memref<2x8x128xf32, #tpu.memory_space<vmem>>, vector<1x8x128xf32>
    %35 = vector.shape_cast %34 : vector<1x8x128xf32> to vector<8x128xf32>
    %c1_35 = arith.constant 1 : index
    %c0_36 = arith.constant 0 : index
    %c0_37 = arith.constant 0 : index
    %36 = vector.load %arg9[%c1_35, %c0_36, %c0_37] : memref<2x8x128xf32, #tpu.memory_space<vmem>>, vector<1x8x128xf32>
    %37 = vector.shape_cast %36 : vector<1x8x128xf32> to vector<8x128xf32>
    %c0_i32_38 = arith.constant 0 : i32
    %c8_i32 = arith.constant 8 : i32
    %38 = arith.muli %c0_i32_38, %c8_i32 : i32
    %39 = tpu.assume_multiple %38, 8 : i32
    %c2_i32_39 = arith.constant 2 : i32
    %40 = arith.subi %c2_i32_39, %c0_i32_38 : i32
    %c8_i32_40 = arith.constant 8 : i32
    %41 = arith.muli %40, %c8_i32_40 : i32
    %42 = tpu.assume_multiple %41, 8 : i32
    %43 = arith.index_cast %39 : i32 to index
    %c0_41 = arith.constant 0 : index
    %44 = vector.load %arg10[%43, %c0_41] : memref<24x384xf32, #tpu.memory_space<vmem>>, vector<8x384xf32>
    %45 = arith.index_cast %42 : i32 to index
    %c0_42 = arith.constant 0 : index
    %46 = vector.load %arg11[%45, %c0_42] : memref<24x384xf32, #tpu.memory_space<vmem>>, vector<8x384xf32>
    %cst_43 = arith.constant dense<0.000000e+00> : vector<8x384xf32>
    %47 = tpu.matmul %35, %23, %cst_43 {dimension_numbers = #tpu.dot_dimension_numbers<[1], [0], [0], [1], [0, 0, 1, 1], [], []>} : vector<8x128xf32>, vector<128x384xf32>, vector<8x384xf32> -> vector<8x384xf32>
    %48 = arith.addf %47, %29 : vector<8x384xf32>
    %cst_44 = arith.constant dense<0.000000e+00> : vector<8x384xf32>
    %49 = tpu.matmul %37, %25, %cst_44 {dimension_numbers = #tpu.dot_dimension_numbers<[1], [0], [0], [1], [0, 0, 1, 1], [], []>} : vector<8x128xf32>, vector<128x384xf32>, vector<8x384xf32> -> vector<8x384xf32>
    %50 = arith.addf %49, %33 : vector<8x384xf32>
    %51 = vector.extract_strided_slice %44 {offsets = [0, 0], sizes = [8, 128], strides = [1, 1]} : vector<8x384xf32> to vector<8x128xf32>
    %52 = vector.extract_strided_slice %44 {offsets = [0, 128], sizes = [8, 128], strides = [1, 1]} : vector<8x384xf32> to vector<8x128xf32>
    %53 = vector.extract_strided_slice %44 {offsets = [0, 256], sizes = [8, 128], strides = [1, 1]} : vector<8x384xf32> to vector<8x128xf32>
    %54 = vector.extract_strided_slice %48 {offsets = [0, 0], sizes = [8, 128], strides = [1, 1]} : vector<8x384xf32> to vector<8x128xf32>
    %55 = vector.extract_strided_slice %48 {offsets = [0, 128], sizes = [8, 128], strides = [1, 1]} : vector<8x384xf32> to vector<8x128xf32>
    %56 = vector.extract_strided_slice %48 {offsets = [0, 256], sizes = [8, 128], strides = [1, 1]} : vector<8x384xf32> to vector<8x128xf32>
    %57 = arith.addf %51, %54 : vector<8x128xf32>
    %58 = arith.negf %57 : vector<8x128xf32>
    %59 = math.exp %58 : vector<8x128xf32>
    %cst_45 = arith.constant 1.000000e+00 : f32
    %60 = vector.broadcast %cst_45 : f32 to vector<8x128xf32>
    %61 = arith.addf %60, %59 : vector<8x128xf32>
    %62 = arith.divf %60, %61 : vector<8x128xf32>
    %63 = arith.addf %52, %55 : vector<8x128xf32>
    %64 = arith.negf %63 : vector<8x128xf32>
    %65 = math.exp %64 : vector<8x128xf32>
    %cst_46 = arith.constant 1.000000e+00 : f32
    %66 = vector.broadcast %cst_46 : f32 to vector<8x128xf32>
    %67 = arith.addf %66, %65 : vector<8x128xf32>
    %68 = arith.divf %66, %67 : vector<8x128xf32>
    %69 = arith.mulf %62, %56 : vector<8x128xf32>
    %70 = arith.addf %53, %69 : vector<8x128xf32>
    %71 = math.tanh %70 : vector<8x128xf32>
    %cst_47 = arith.constant 1.000000e+00 : f32
    %72 = vector.broadcast %cst_47 : f32 to vector<8x128xf32>
    %73 = arith.subf %72, %68 : vector<8x128xf32>
    %74 = arith.mulf %73, %71 : vector<8x128xf32>
    %75 = arith.mulf %68, %35 : vector<8x128xf32>
    %76 = arith.addf %74, %75 : vector<8x128xf32>
    %77 = vector.extract_strided_slice %46 {offsets = [0, 0], sizes = [8, 128], strides = [1, 1]} : vector<8x384xf32> to vector<8x128xf32>
    %78 = vector.extract_strided_slice %46 {offsets = [0, 128], sizes = [8, 128], strides = [1, 1]} : vector<8x384xf32> to vector<8x128xf32>
    %79 = vector.extract_strided_slice %46 {offsets = [0, 256], sizes = [8, 128], strides = [1, 1]} : vector<8x384xf32> to vector<8x128xf32>
    %80 = vector.extract_strided_slice %50 {offsets = [0, 0], sizes = [8, 128], strides = [1, 1]} : vector<8x384xf32> to vector<8x128xf32>
    %81 = vector.extract_strided_slice %50 {offsets = [0, 128], sizes = [8, 128], strides = [1, 1]} : vector<8x384xf32> to vector<8x128xf32>
    %82 = vector.extract_strided_slice %50 {offsets = [0, 256], sizes = [8, 128], strides = [1, 1]} : vector<8x384xf32> to vector<8x128xf32>
    %83 = arith.addf %77, %80 : vector<8x128xf32>
    %84 = arith.negf %83 : vector<8x128xf32>
    %85 = math.exp %84 : vector<8x128xf32>
    %cst_48 = arith.constant 1.000000e+00 : f32
    %86 = vector.broadcast %cst_48 : f32 to vector<8x128xf32>
    %87 = arith.addf %86, %85 : vector<8x128xf32>
    %88 = arith.divf %86, %87 : vector<8x128xf32>
    %89 = arith.addf %78, %81 : vector<8x128xf32>
    %90 = arith.negf %89 : vector<8x128xf32>
    %91 = math.exp %90 : vector<8x128xf32>
    %cst_49 = arith.constant 1.000000e+00 : f32
    %92 = vector.broadcast %cst_49 : f32 to vector<8x128xf32>
    %93 = arith.addf %92, %91 : vector<8x128xf32>
    %94 = arith.divf %92, %93 : vector<8x128xf32>
    %95 = arith.mulf %88, %82 : vector<8x128xf32>
    %96 = arith.addf %79, %95 : vector<8x128xf32>
    %97 = math.tanh %96 : vector<8x128xf32>
    %cst_50 = arith.constant 1.000000e+00 : f32
    %98 = vector.broadcast %cst_50 : f32 to vector<8x128xf32>
    %99 = arith.subf %98, %94 : vector<8x128xf32>
    %100 = arith.mulf %99, %97 : vector<8x128xf32>
    %101 = arith.mulf %94, %37 : vector<8x128xf32>
    %102 = arith.addf %100, %101 : vector<8x128xf32>
    %c3_i32 = arith.constant 3 : i32
    %103 = arith.muli %arg0, %c3_i32 : i32
    %104 = arith.addi %103, %c0_i32_38 : i32
    %c3_i32_51 = arith.constant 3 : i32
    %105 = arith.muli %0, %c3_i32_51 : i32
    %c2_i32_52 = arith.constant 2 : i32
    %106 = arith.subi %c2_i32_52, %c0_i32_38 : i32
    %107 = arith.addi %105, %106 : i32
    %c8_i32_53 = arith.constant 8 : i32
    %108 = arith.cmpi slt, %104, %c8_i32_53 : i32
    %109 = arith.select %108, %76, %35 : vector<8x128xf32>
    %c8_i32_54 = arith.constant 8 : i32
    %110 = arith.cmpi slt, %107, %c8_i32_54 : i32
    %111 = arith.select %110, %102, %37 : vector<8x128xf32>
    %112 = arith.index_cast %39 : i32 to index
    %c0_55 = arith.constant 0 : index
    %113 = vector.load %arg7[%112, %c0_55] : memref<24x128xf32, #tpu.memory_space<vmem>>, vector<8x128xf32>
    tpu.vector_store %arg7[%112, %c0_55], %109 {strides = array<i32>} : memref<24x128xf32, #tpu.memory_space<vmem>>, vector<8x128xf32>,
    %114 = arith.index_cast %42 : i32 to index
    %c0_56 = arith.constant 0 : index
    %115 = vector.load %arg8[%114, %c0_56] : memref<24x128xf32, #tpu.memory_space<vmem>>, vector<8x128xf32>
    tpu.vector_store %arg8[%114, %c0_56], %111 {strides = array<i32>} : memref<24x128xf32, #tpu.memory_space<vmem>>, vector<8x128xf32>,
    %c1_i32 = arith.constant 1 : i32
    %c8_i32_57 = arith.constant 8 : i32
    %116 = arith.muli %c1_i32, %c8_i32_57 : i32
    %117 = tpu.assume_multiple %116, 8 : i32
    %c2_i32_58 = arith.constant 2 : i32
    %118 = arith.subi %c2_i32_58, %c1_i32 : i32
    %c8_i32_59 = arith.constant 8 : i32
    %119 = arith.muli %118, %c8_i32_59 : i32
    %120 = tpu.assume_multiple %119, 8 : i32
    %121 = arith.index_cast %117 : i32 to index
    %c0_60 = arith.constant 0 : index
    %122 = vector.load %arg10[%121, %c0_60] : memref<24x384xf32, #tpu.memory_space<vmem>>, vector<8x384xf32>
    %123 = arith.index_cast %120 : i32 to index
    %c0_61 = arith.constant 0 : index
    %124 = vector.load %arg11[%123, %c0_61] : memref<24x384xf32, #tpu.memory_space<vmem>>, vector<8x384xf32>
    %cst_62 = arith.constant dense<0.000000e+00> : vector<8x384xf32>
    %125 = tpu.matmul %109, %23, %cst_62 {dimension_numbers = #tpu.dot_dimension_numbers<[1], [0], [0], [1], [0, 0, 1, 1], [], []>} : vector<8x128xf32>, vector<128x384xf32>, vector<8x384xf32> -> vector<8x384xf32>
    %126 = arith.addf %125, %29 : vector<8x384xf32>
    %cst_63 = arith.constant dense<0.000000e+00> : vector<8x384xf32>
    %127 = tpu.matmul %111, %25, %cst_63 {dimension_numbers = #tpu.dot_dimension_numbers<[1], [0], [0], [1], [0, 0, 1, 1], [], []>} : vector<8x128xf32>, vector<128x384xf32>, vector<8x384xf32> -> vector<8x384xf32>
    %128 = arith.addf %127, %33 : vector<8x384xf32>
    %129 = vector.extract_strided_slice %122 {offsets = [0, 0], sizes = [8, 128], strides = [1, 1]} : vector<8x384xf32> to vector<8x128xf32>
    %130 = vector.extract_strided_slice %122 {offsets = [0, 128], sizes = [8, 128], strides = [1, 1]} : vector<8x384xf32> to vector<8x128xf32>
    %131 = vector.extract_strided_slice %122 {offsets = [0, 256], sizes = [8, 128], strides = [1, 1]} : vector<8x384xf32> to vector<8x128xf32>
    %132 = vector.extract_strided_slice %126 {offsets = [0, 0], sizes = [8, 128], strides = [1, 1]} : vector<8x384xf32> to vector<8x128xf32>
    %133 = vector.extract_strided_slice %126 {offsets = [0, 128], sizes = [8, 128], strides = [1, 1]} : vector<8x384xf32> to vector<8x128xf32>
    %134 = vector.extract_strided_slice %126 {offsets = [0, 256], sizes = [8, 128], strides = [1, 1]} : vector<8x384xf32> to vector<8x128xf32>
    %135 = arith.addf %129, %132 : vector<8x128xf32>
    %136 = arith.negf %135 : vector<8x128xf32>
    %137 = math.exp %136 : vector<8x128xf32>
    %cst_64 = arith.constant 1.000000e+00 : f32
    %138 = vector.broadcast %cst_64 : f32 to vector<8x128xf32>
    %139 = arith.addf %138, %137 : vector<8x128xf32>
    %140 = arith.divf %138, %139 : vector<8x128xf32>
    %141 = arith.addf %130, %133 : vector<8x128xf32>
    %142 = arith.negf %141 : vector<8x128xf32>
    %143 = math.exp %142 : vector<8x128xf32>
    %cst_65 = arith.constant 1.000000e+00 : f32
    %144 = vector.broadcast %cst_65 : f32 to vector<8x128xf32>
    %145 = arith.addf %144, %143 : vector<8x128xf32>
    %146 = arith.divf %144, %145 : vector<8x128xf32>
    %147 = arith.mulf %140, %134 : vector<8x128xf32>
    %148 = arith.addf %131, %147 : vector<8x128xf32>
    %149 = math.tanh %148 : vector<8x128xf32>
    %cst_66 = arith.constant 1.000000e+00 : f32
    %150 = vector.broadcast %cst_66 : f32 to vector<8x128xf32>
    %151 = arith.subf %150, %146 : vector<8x128xf32>
    %152 = arith.mulf %151, %149 : vector<8x128xf32>
    %153 = arith.mulf %146, %109 : vector<8x128xf32>
    %154 = arith.addf %152, %153 : vector<8x128xf32>
    %155 = vector.extract_strided_slice %124 {offsets = [0, 0], sizes = [8, 128], strides = [1, 1]} : vector<8x384xf32> to vector<8x128xf32>
    %156 = vector.extract_strided_slice %124 {offsets = [0, 128], sizes = [8, 128], strides = [1, 1]} : vector<8x384xf32> to vector<8x128xf32>
    %157 = vector.extract_strided_slice %124 {offsets = [0, 256], sizes = [8, 128], strides = [1, 1]} : vector<8x384xf32> to vector<8x128xf32>
    %158 = vector.extract_strided_slice %128 {offsets = [0, 0], sizes = [8, 128], strides = [1, 1]} : vector<8x384xf32> to vector<8x128xf32>
    %159 = vector.extract_strided_slice %128 {offsets = [0, 128], sizes = [8, 128], strides = [1, 1]} : vector<8x384xf32> to vector<8x128xf32>
    %160 = vector.extract_strided_slice %128 {offsets = [0, 256], sizes = [8, 128], strides = [1, 1]} : vector<8x384xf32> to vector<8x128xf32>
    %161 = arith.addf %155, %158 : vector<8x128xf32>
    %162 = arith.negf %161 : vector<8x128xf32>
    %163 = math.exp %162 : vector<8x128xf32>
    %cst_67 = arith.constant 1.000000e+00 : f32
    %164 = vector.broadcast %cst_67 : f32 to vector<8x128xf32>
    %165 = arith.addf %164, %163 : vector<8x128xf32>
    %166 = arith.divf %164, %165 : vector<8x128xf32>
    %167 = arith.addf %156, %159 : vector<8x128xf32>
    %168 = arith.negf %167 : vector<8x128xf32>
    %169 = math.exp %168 : vector<8x128xf32>
    %cst_68 = arith.constant 1.000000e+00 : f32
    %170 = vector.broadcast %cst_68 : f32 to vector<8x128xf32>
    %171 = arith.addf %170, %169 : vector<8x128xf32>
    %172 = arith.divf %170, %171 : vector<8x128xf32>
    %173 = arith.mulf %166, %160 : vector<8x128xf32>
    %174 = arith.addf %157, %173 : vector<8x128xf32>
    %175 = math.tanh %174 : vector<8x128xf32>
    %cst_69 = arith.constant 1.000000e+00 : f32
    %176 = vector.broadcast %cst_69 : f32 to vector<8x128xf32>
    %177 = arith.subf %176, %172 : vector<8x128xf32>
    %178 = arith.mulf %177, %175 : vector<8x128xf32>
    %179 = arith.mulf %172, %111 : vector<8x128xf32>
    %180 = arith.addf %178, %179 : vector<8x128xf32>
    %c3_i32_70 = arith.constant 3 : i32
    %181 = arith.muli %arg0, %c3_i32_70 : i32
    %182 = arith.addi %181, %c1_i32 : i32
    %c3_i32_71 = arith.constant 3 : i32
    %183 = arith.muli %0, %c3_i32_71 : i32
    %c2_i32_72 = arith.constant 2 : i32
    %184 = arith.subi %c2_i32_72, %c1_i32 : i32
    %185 = arith.addi %183, %184 : i32
    %c8_i32_73 = arith.constant 8 : i32
    %186 = arith.cmpi slt, %182, %c8_i32_73 : i32
    %187 = arith.select %186, %154, %109 : vector<8x128xf32>
    %c8_i32_74 = arith.constant 8 : i32
    %188 = arith.cmpi slt, %185, %c8_i32_74 : i32
    %189 = arith.select %188, %180, %111 : vector<8x128xf32>
    %190 = arith.index_cast %117 : i32 to index
    %c0_75 = arith.constant 0 : index
    %191 = vector.load %arg7[%190, %c0_75] : memref<24x128xf32, #tpu.memory_space<vmem>>, vector<8x128xf32>
    tpu.vector_store %arg7[%190, %c0_75], %187 {strides = array<i32>} : memref<24x128xf32, #tpu.memory_space<vmem>>, vector<8x128xf32>,
    %192 = arith.index_cast %120 : i32 to index
    %c0_76 = arith.constant 0 : index
    %193 = vector.load %arg8[%192, %c0_76] : memref<24x128xf32, #tpu.memory_space<vmem>>, vector<8x128xf32>
    tpu.vector_store %arg8[%192, %c0_76], %189 {strides = array<i32>} : memref<24x128xf32, #tpu.memory_space<vmem>>, vector<8x128xf32>,
    %c2_i32_77 = arith.constant 2 : i32
    %c8_i32_78 = arith.constant 8 : i32
    %194 = arith.muli %c2_i32_77, %c8_i32_78 : i32
    %195 = tpu.assume_multiple %194, 8 : i32
    %c2_i32_79 = arith.constant 2 : i32
    %196 = arith.subi %c2_i32_79, %c2_i32_77 : i32
    %c8_i32_80 = arith.constant 8 : i32
    %197 = arith.muli %196, %c8_i32_80 : i32
    %198 = tpu.assume_multiple %197, 8 : i32
    %199 = arith.index_cast %195 : i32 to index
    %c0_81 = arith.constant 0 : index
    %200 = vector.load %arg10[%199, %c0_81] : memref<24x384xf32, #tpu.memory_space<vmem>>, vector<8x384xf32>
    %201 = arith.index_cast %198 : i32 to index
    %c0_82 = arith.constant 0 : index
    %202 = vector.load %arg11[%201, %c0_82] : memref<24x384xf32, #tpu.memory_space<vmem>>, vector<8x384xf32>
    %cst_83 = arith.constant dense<0.000000e+00> : vector<8x384xf32>
    %203 = tpu.matmul %187, %23, %cst_83 {dimension_numbers = #tpu.dot_dimension_numbers<[1], [0], [0], [1], [0, 0, 1, 1], [], []>} : vector<8x128xf32>, vector<128x384xf32>, vector<8x384xf32> -> vector<8x384xf32>
    %204 = arith.addf %203, %29 : vector<8x384xf32>
    %cst_84 = arith.constant dense<0.000000e+00> : vector<8x384xf32>
    %205 = tpu.matmul %189, %25, %cst_84 {dimension_numbers = #tpu.dot_dimension_numbers<[1], [0], [0], [1], [0, 0, 1, 1], [], []>} : vector<8x128xf32>, vector<128x384xf32>, vector<8x384xf32> -> vector<8x384xf32>
    %206 = arith.addf %205, %33 : vector<8x384xf32>
    %207 = vector.extract_strided_slice %200 {offsets = [0, 0], sizes = [8, 128], strides = [1, 1]} : vector<8x384xf32> to vector<8x128xf32>
    %208 = vector.extract_strided_slice %200 {offsets = [0, 128], sizes = [8, 128], strides = [1, 1]} : vector<8x384xf32> to vector<8x128xf32>
    %209 = vector.extract_strided_slice %200 {offsets = [0, 256], sizes = [8, 128], strides = [1, 1]} : vector<8x384xf32> to vector<8x128xf32>
    %210 = vector.extract_strided_slice %204 {offsets = [0, 0], sizes = [8, 128], strides = [1, 1]} : vector<8x384xf32> to vector<8x128xf32>
    %211 = vector.extract_strided_slice %204 {offsets = [0, 128], sizes = [8, 128], strides = [1, 1]} : vector<8x384xf32> to vector<8x128xf32>
    %212 = vector.extract_strided_slice %204 {offsets = [0, 256], sizes = [8, 128], strides = [1, 1]} : vector<8x384xf32> to vector<8x128xf32>
    %213 = arith.addf %207, %210 : vector<8x128xf32>
    %214 = arith.negf %213 : vector<8x128xf32>
    %215 = math.exp %214 : vector<8x128xf32>
    %cst_85 = arith.constant 1.000000e+00 : f32
    %216 = vector.broadcast %cst_85 : f32 to vector<8x128xf32>
    %217 = arith.addf %216, %215 : vector<8x128xf32>
    %218 = arith.divf %216, %217 : vector<8x128xf32>
    %219 = arith.addf %208, %211 : vector<8x128xf32>
    %220 = arith.negf %219 : vector<8x128xf32>
    %221 = math.exp %220 : vector<8x128xf32>
    %cst_86 = arith.constant 1.000000e+00 : f32
    %222 = vector.broadcast %cst_86 : f32 to vector<8x128xf32>
    %223 = arith.addf %222, %221 : vector<8x128xf32>
    %224 = arith.divf %222, %223 : vector<8x128xf32>
    %225 = arith.mulf %218, %212 : vector<8x128xf32>
    %226 = arith.addf %209, %225 : vector<8x128xf32>
    %227 = math.tanh %226 : vector<8x128xf32>
    %cst_87 = arith.constant 1.000000e+00 : f32
    %228 = vector.broadcast %cst_87 : f32 to vector<8x128xf32>
    %229 = arith.subf %228, %224 : vector<8x128xf32>
    %230 = arith.mulf %229, %227 : vector<8x128xf32>
    %231 = arith.mulf %224, %187 : vector<8x128xf32>
    %232 = arith.addf %230, %231 : vector<8x128xf32>
    %233 = vector.extract_strided_slice %202 {offsets = [0, 0], sizes = [8, 128], strides = [1, 1]} : vector<8x384xf32> to vector<8x128xf32>
    %234 = vector.extract_strided_slice %202 {offsets = [0, 128], sizes = [8, 128], strides = [1, 1]} : vector<8x384xf32> to vector<8x128xf32>
    %235 = vector.extract_strided_slice %202 {offsets = [0, 256], sizes = [8, 128], strides = [1, 1]} : vector<8x384xf32> to vector<8x128xf32>
    %236 = vector.extract_strided_slice %206 {offsets = [0, 0], sizes = [8, 128], strides = [1, 1]} : vector<8x384xf32> to vector<8x128xf32>
    %237 = vector.extract_strided_slice %206 {offsets = [0, 128], sizes = [8, 128], strides = [1, 1]} : vector<8x384xf32> to vector<8x128xf32>
    %238 = vector.extract_strided_slice %206 {offsets = [0, 256], sizes = [8, 128], strides = [1, 1]} : vector<8x384xf32> to vector<8x128xf32>
    %239 = arith.addf %233, %236 : vector<8x128xf32>
    %240 = arith.negf %239 : vector<8x128xf32>
    %241 = math.exp %240 : vector<8x128xf32>
    %cst_88 = arith.constant 1.000000e+00 : f32
    %242 = vector.broadcast %cst_88 : f32 to vector<8x128xf32>
    %243 = arith.addf %242, %241 : vector<8x128xf32>
    %244 = arith.divf %242, %243 : vector<8x128xf32>
    %245 = arith.addf %234, %237 : vector<8x128xf32>
    %246 = arith.negf %245 : vector<8x128xf32>
    %247 = math.exp %246 : vector<8x128xf32>
    %cst_89 = arith.constant 1.000000e+00 : f32
    %248 = vector.broadcast %cst_89 : f32 to vector<8x128xf32>
    %249 = arith.addf %248, %247 : vector<8x128xf32>
    %250 = arith.divf %248, %249 : vector<8x128xf32>
    %251 = arith.mulf %244, %238 : vector<8x128xf32>
    %252 = arith.addf %235, %251 : vector<8x128xf32>
    %253 = math.tanh %252 : vector<8x128xf32>
    %cst_90 = arith.constant 1.000000e+00 : f32
    %254 = vector.broadcast %cst_90 : f32 to vector<8x128xf32>
    %255 = arith.subf %254, %250 : vector<8x128xf32>
    %256 = arith.mulf %255, %253 : vector<8x128xf32>
    %257 = arith.mulf %250, %189 : vector<8x128xf32>
    %258 = arith.addf %256, %257 : vector<8x128xf32>
    %c3_i32_91 = arith.constant 3 : i32
    %259 = arith.muli %arg0, %c3_i32_91 : i32
    %260 = arith.addi %259, %c2_i32_77 : i32
    %c3_i32_92 = arith.constant 3 : i32
    %261 = arith.muli %0, %c3_i32_92 : i32
    %c2_i32_93 = arith.constant 2 : i32
    %262 = arith.subi %c2_i32_93, %c2_i32_77 : i32
    %263 = arith.addi %261, %262 : i32
    %c8_i32_94 = arith.constant 8 : i32
    %264 = arith.cmpi slt, %260, %c8_i32_94 : i32
    %265 = arith.select %264, %232, %187 : vector<8x128xf32>
    %c8_i32_95 = arith.constant 8 : i32
    %266 = arith.cmpi slt, %263, %c8_i32_95 : i32
    %267 = arith.select %266, %258, %189 : vector<8x128xf32>
    %268 = arith.index_cast %195 : i32 to index
    %c0_96 = arith.constant 0 : index
    %269 = vector.load %arg7[%268, %c0_96] : memref<24x128xf32, #tpu.memory_space<vmem>>, vector<8x128xf32>
    tpu.vector_store %arg7[%268, %c0_96], %265 {strides = array<i32>} : memref<24x128xf32, #tpu.memory_space<vmem>>, vector<8x128xf32>,
    %270 = arith.index_cast %198 : i32 to index
    %c0_97 = arith.constant 0 : index
    %271 = vector.load %arg8[%270, %c0_97] : memref<24x128xf32, #tpu.memory_space<vmem>>, vector<8x128xf32>
    tpu.vector_store %arg8[%270, %c0_97], %267 {strides = array<i32>} : memref<24x128xf32, #tpu.memory_space<vmem>>, vector<8x128xf32>,
    %c3_i32_98 = arith.constant 3 : i32
    %c0_99 = arith.constant 0 : index
    %c0_100 = arith.constant 0 : index
    %c0_101 = arith.constant 0 : index
    %272 = vector.load %arg9[%c0_99, %c0_100, %c0_101] : memref<2x8x128xf32, #tpu.memory_space<vmem>>, vector<1x8x128xf32>
    %273 = vector.shape_cast %272 : vector<1x8x128xf32> to vector<8x128xf32>
    %274 = vector.shape_cast %265 : vector<8x128xf32> to vector<1x8x128xf32>
    tpu.vector_store %arg9[%c0_99, %c0_100, %c0_101], %274 {strides = array<i32>} : memref<2x8x128xf32, #tpu.memory_space<vmem>>, vector<1x8x128xf32>,
    %c1_102 = arith.constant 1 : index
    %c0_103 = arith.constant 0 : index
    %c0_104 = arith.constant 0 : index
    %275 = vector.load %arg9[%c1_102, %c0_103, %c0_104] : memref<2x8x128xf32, #tpu.memory_space<vmem>>, vector<1x8x128xf32>
    %276 = vector.shape_cast %275 : vector<1x8x128xf32> to vector<8x128xf32>
    %277 = vector.shape_cast %267 : vector<8x128xf32> to vector<1x8x128xf32>
    tpu.vector_store %arg9[%c1_102, %c0_103, %c0_104], %277 {strides = array<i32>} : memref<2x8x128xf32, #tpu.memory_space<vmem>>, vector<1x8x128xf32>,
    return
  }
  func.func @transform_0(%arg0: i32) -> (i32, i32) {
    %c0_i32 = arith.constant 0 : i32
    %c0_i32_0 = arith.constant 0 : i32
    return %arg0, %c0_i32 : i32, i32
  }
  func.func @transform_1(%arg0: i32) -> (i32, i32) {
    %c2_i32 = arith.constant 2 : i32
    %0 = arith.subi %c2_i32, %arg0 : i32
    %c0_i32 = arith.constant 0 : i32
    %c0_i32_0 = arith.constant 0 : i32
    return %0, %c0_i32 : i32, i32
  }
  func.func @transform_2(%arg0: i32) -> (i32, i32, i32) {
    %c0_i32 = arith.constant 0 : i32
    %c0_i32_0 = arith.constant 0 : i32
    %c0_i32_1 = arith.constant 0 : i32
    %c0_i32_2 = arith.constant 0 : i32
    return %c0_i32, %c0_i32_0, %c0_i32_1 : i32, i32, i32
  }
  func.func @transform_3(%arg0: i32) -> (i32, i32, i32) {
    %c0_i32 = arith.constant 0 : i32
    %c0_i32_0 = arith.constant 0 : i32
    %c0_i32_1 = arith.constant 0 : i32
    %c0_i32_2 = arith.constant 0 : i32
    return %c0_i32, %c0_i32_0, %c0_i32_1 : i32, i32, i32
  }
  func.func @transform_4(%arg0: i32) -> (i32, i32, i32) {
    %c0_i32 = arith.constant 0 : i32
    %c0_i32_0 = arith.constant 0 : i32
    %c0_i32_1 = arith.constant 0 : i32
    %c0_i32_2 = arith.constant 0 : i32
    return %c0_i32, %c0_i32_0, %c0_i32_1 : i32, i32, i32
  }
  func.func @transform_5(%arg0: i32) -> (i32, i32, i32) {
    %c0_i32 = arith.constant 0 : i32
    %c0_i32_0 = arith.constant 0 : i32
    %c0_i32_1 = arith.constant 0 : i32
    %c0_i32_2 = arith.constant 0 : i32
    return %c0_i32, %c0_i32_0, %c0_i32_1 : i32, i32, i32
  }
  func.func @transform_6(%arg0: i32) -> (i32, i32) {
    %c0_i32 = arith.constant 0 : i32
    %c0_i32_0 = arith.constant 0 : i32
    return %arg0, %c0_i32 : i32, i32
  }
  func.func @transform_7(%arg0: i32) -> (i32, i32) {
    %c2_i32 = arith.constant 2 : i32
    %0 = arith.subi %c2_i32, %arg0 : i32
    %c0_i32 = arith.constant 0 : i32
    %c0_i32_0 = arith.constant 0 : i32
    return %0, %c0_i32 : i32, i32
  }
  func.func @transform_8(%arg0: i32) -> (i32, i32, i32) {
    %c0_i32 = arith.constant 0 : i32
    %c0_i32_0 = arith.constant 0 : i32
    %c0_i32_1 = arith.constant 0 : i32
    %c0_i32_2 = arith.constant 0 : i32
    return %c0_i32, %c0_i32_0, %c0_i32_1 : i32, i32, i32
  }
}

</mosaic_0001>

<bundles_post_ra>
// kernel: tpu_custom_call.1
= control target key start
LH: loop header
LB: loop body
LE: loop exit
PB: predicated region body
PF: predicated region fallthrough
CT: control target
= control target key end

     0   :  { %s3936_s0 = inlined_call_operand.vmem [shape: bf16[72,16], index: 0, kind: input, shape index: {}]   ;;  %s3937_s1 = inlined_call_operand.vmem [shape: bf16[72,16], index: 1, kind: input, shape index: {}]   ;;  %s3938_s2 = inlined_call_operand.vmem [shape: bf16[2,16,384], index: 2, kind: input, shape index: {}]   ;;  %s3939_s3 = inlined_call_operand.hbm [shape: f32[2,128,384], index: 3, kind: input, shape index: {}]   ;;  %s3940_s4 = inlined_call_operand.vmem [shape: f32[2,1,384], index: 4, kind: input, shape index: {}]   ;;  %s3941_s5 = inlined_call_operand.vmem [shape: f32[2,1,384], index: 5, kind: input, shape index: {}]   ;;  %s3942_s6 = inlined_call_operand.hbm [shape: f32[72,128], index: 6, kind: output, shape index: {0}]   ;;  %s3943_s7 = inlined_call_operand.hbm [shape: f32[72,128], index: 7, kind: output, shape index: {1}]   ;;  %s3944_s8 = inlined_call_operand.hbm [shape: f32[2,8,128], index: 8, kind: output, shape index: {2}]  }
   0x1   :  { %4017 = sst [smem:[#allocation91_spill]] %s3939_s3 }
   0x2   :  { %14 = vsyncpa [#allocation5], 0 }
   0x3   :  { %15 = vsyncpa [#allocation6], 0 }
   0x4   :  { %17 = vsyncpa [#allocation6 + $0x1], 0 }
   0x5   :  { %18 = vsyncpa [#allocation9], 0 }
   0x6   :  { %20 = vsyncpa [#allocation9 + $0x1], 0  ;;  %s2892_s27 = smov 0   ;;  %s2894_s28 = smov 0  }
   0x7   :  { %s2896_s29 = smov 0   ;;  %s2898_s30 = smov 0  }
   0x8   :  { %s2900_s9 = smov 0   ;;  %s2902_s10 = smov 0  }
   0x9   :  { %s2904_s11 = smov 0  }
   0xa LB: > { %4018 = sst [smem:[#allocation15_spill]] %s2813_s28  ;;  %s2928_s12 = sadd.s32 4294967295, %s2833_s11   ;;  %s2833_s11 = sphi %s2904_s11, %s4185_s11   ;;  %s2829_s10 = sphi %s2902_s10, %s4190_s10   ;;  %s2825_s9 = sphi %s2900_s9, %s4192_s9   ;;  %s2821_s30 = sphi %s2898_s30, %s4191_s30   ;;  %s2817_s29 = sphi %s2896_s29, %s4188_s29   ;;  %s2813_s28 = sphi %s2894_s28, %s4187_s28   ;;  %s2809_s27 = sphi %s2892_s27, %s4186_s27  }
   0xb   : > { %4019 = sst [smem:[#allocation16_spill]] %s2817_s29  ;;  %s3947_s13 = sadd.s32 4294967294, %s2833_s11  }
   0xc   : > { %4020 = sst [smem:[#allocation17_spill]] %s2829_s10  ;;  %s2932_s14 = sadd.s32 1, %s2833_s11  }
   0xd   : > { %4021 = sst [smem:[#allocation18_spill]] %s2932_s14  ;;  %s171_s15 = sadd.s32 1, %s2829_s10 }
   0xe   : > { %s168_s16 = ssub.s32 %s2833_s11, %s2932_s14  ;;  %p181_p0 = scmp.ne.s32.totalorder %s2829_s10, %s2825_s9 }
   0xf   : > { %p169_p1 = scmp.eq.s32.totalorder %s168_s16, 0  ;;  %p3945_p2 = scmp.eq.s32.totalorder %s2928_s12, 2 }
  0x10   : > { %p187_p3 = scmp.ne.s32.totalorder %s2825_s9, %s2821_s30  ;;  %p2944_p4 = scmp.eq.s32.totalorder %s3947_s13, 2 }
  0x11   : > { %s2949_s18 = scalar_select %p169_p1, %s2829_s10, %s171_s15  }
  0x12   : > { %p2953_p5 = por %p3945_p2, %p181_p0  ;;  %p2959_p6 = por %p2944_p4, %p187_p3 }
  0x13   : > { %4023 = sst [smem:[#allocation19_spill]] %s2949_s18  ;;  %s194_s21 = ssub.s32 2, %s2833_s11 }
  0x14   : > { %s4025_s20 = scalar_select %p2959_p6, 1, 0 }
  0x15   : > { %s195_s22 = ssub.s32 2, %s2932_s14  ;;  %s199_s24 = sadd.s32 1, %s2817_s29 }
  0x16   : > { %s196_s23 = ssub.s32 %s194_s21, %s195_s22  ;;  %p209_p8 = scmp.ne.s32.totalorder %s2817_s29, %s2813_s28 }
  0x17   : > { %p197_p7 = scmp.eq.s32.totalorder %s196_s23, 0  ;;  %p215_p9 = scmp.ne.s32.totalorder %s2813_s28, %s2809_s27 }
  0x18   : > { %p2068_p10 = scmp.ge.s32.totalorder %s2833_s11, 1  ;;  %p2976_p11 = por %p209_p8, %p3945_p2 }
  0x19   : > { %s2972_s25 = scalar_select %p197_p7, %s2817_s29, %s199_s24  }
  0x1a   : > { %s4027_s26 = scalar_select %p2976_p11, 1, 0 }
  0x1b   : > { %4026 = sst [smem:[#allocation20_spill]] %s2972_s25  ;;  %p2982_p12 = por %p215_p9, %p2944_p4 }
  0x1c   : > { %p244_p13 = scmp.lt.s32.totalorder %s2833_s11, 4  ;;  %p2479_p1 = scmp.eq.s32.totalorder %s2928_s12, 0 }
  0x1d   : > { %s4028_s15 = scalar_select %p2982_p12, 1, 0 }
  0x1e   : > { %p2989_p3 = pnand %p2068_p10, %p244_p13  ;;  %s2835_s27 = smov [#allocation4]  }
  0x1f   : > { %4029 = sst [smem:[#allocation21_spill]] %s4028_s15  ;;  %s259_s21 = sshll.u32 %s2835_s27, 4  ;;  %s260_s21 = int_to_ptr.vmem [resolvable:$true] %s259_s21 }
  0x20   : > { %p2468_p7 = pneg %p2989_p3  ;;  %s2672_s17 = scalar_lea.vmem %s260_s21, 12288 }
  0x21   : > { %p2673_p4 = scmp.ne.s32.totalorder %s260_s21, %s2672_s17  ;;  %p2680_p6 = scmp.lt.s32.totalorder %s260_s21, %s260_s21 }
  0x22   : > { %p2469_p8 = pnand %p2479_p1, %p2468_p7  ;;  %p2681_p0 = scmp.lt.s32.totalorder %s2672_s17, %s2672_s17 }
  0x24   : > { %p2663_p2 = pneg %p2469_p8  ;;  %p2682_p11 = por %p2681_p0, %p2680_p6 }
  0x26   : > { %p2675_p9 = pnand %p2673_p4, %p2663_p2 }
  0x28   : > { %p2676_p12 = pneg %p2675_p9 }
  0x2a   : > { %p2683_p10 = pnand %p2682_p11, %p2676_p12 }
  0x2c   : > { %2686 = shalt.err (!%p2683_p10)
}
  0x2d   : > { %s2836_s22 = smov 384   ;;  %s2837_s23 = smov 24  }
  0x2e   : > { %s4031_s3 = sld [smem:[#allocation91_spill]] }
  0x30   : > { %301 = sbr.rel (%p2989_p3) target bundleno = 938 (0x3aa), region = 44 }
  0x34   : > { %2471 = dma.hbm_to_vmem [thread:$0]  (!%p2469_p8), %s4031_s3, 12288, %s260_s21, [#allocation5], %s2836_s22, %s2836_s22, %s2837_s23  }
  0x35   : > { %2792 = dma.done.wait (%p2479_p1), [#allocation5], 12288  }
  0x36   : > { %2794 = vsyncadd (%p2479_p1), [#allocation5], 4294955008  ;;  %s3948_s27 = sand.u32 1, %s2825_s9   ;;  %s341_s17 = sand.u32 1, %s2813_s28  }
  0x37   : > { %s2454_s13 = smul.u32 24, %s3948_s27  ;;  %s3952_s21 = ssub.s32 2, %s2928_s12 }
  0x38   : > { %s2455_s22 = smul.u32 24, %s341_s17  ;;  %p4032_p11 = scmp.ne.s32.totalorder %s2928_s12, 0 }
  0x39   : > { %s3012_s16 = smul.u32 3, %s2928_s12  ;;  %s3034_s14 = scalar_lea.vmem [#allocation7], %s2454_s13 }
  0x3a   : > { %s3016_s23 = smul.u32 3, %s3952_s21  ;;  %s3036_s15 = scalar_lea.vmem [#allocation8], %s2455_s22 }
  0x3b   : > { %p347_p2 = scmp.lt.s32.totalorder %s3012_s16, 8 }
  0x3c   : > { %p354_p6 = scmp.lt.s32.totalorder %s3016_s23, 8 }
  0x3d   : > { %s348_s24 = scalar_select %p347_p2, %s3012_s16, 8 }
  0x3e   : > { %s355_s3 = scalar_select %p354_p6, %s3016_s23, 8 }
  0x3f   : > { %s2073_s27 = sshll.u32 %s348_s24, 2  ;;  %368 = sbr.rel (%p4032_p11) target bundleno = 70 (0x46), region = 52 }
  0x40   : > { %s350_s10 = scalar_lea.vmem %s3936_s0, %s2073_s27  ;;  %s2074_s25 = sshll.u32 %s355_s3, 2 }
  0x41   : > { %s3032_s21 = scalar_lea.vmem %s3937_s1, %s2074_s25 }
  0x44   : > { %v2838_v0 = vmov 0.0  }
  0x45   : > { %369 = vst [vmem:[#allocation10] sm:$0xff] %v2838_v0  ;;  %370 = vst [vmem:[#allocation10 + $0x8] sm:$0xff] %v2838_v0 }
  0x46 PF: > { %v2550_v1 = vld [vmem:[%s3938_s2 + $0x8] ss:$12 sps:$4 sm:$0xff]   ;;  %v2551_v2 = vld [vmem:[%s350_s10] sm:$0xff]   ;;  %vm419_vm0 = vcmask 130048   ;;  %v2839_v6 = vmov 0   ;;  %v3063_v12 = vld [vmem:[#allocation4 + $0x158] sm:$0xff] }
  0x47   : > { %2232 = vmatprep.subr.bf16.mxu1 %v2550_v1  ;;  %v2552_v3 = vld [vmem:[%s350_s10 + $0x8] ss:$0 sps:$4 sm:$0xff]   ;;  %2234 = vmatprep.mubr.msk.bf16.mxu1 %vm419_vm0, %v2551_v2  ;;  %v2553_v4 = vld [vmem:[%s3938_s2 + $0x18] ss:$12 sps:$4 sm:$0xff]   ;;  %v3050_v7 = vld [vmem:[#allocation4 + $0x170] sm:$0xff]  ;;  %v3994_v22 = vmov 0.0  }
  0x48   : > { %2233 = vmatpush3.bf16.msra.mxu1 %v2550_v1  ;;  %v2555_v5 = vld [vmem:[%s3938_s2 + $0x1c] ss:$12 sps:$4 sm:$0xff]   ;;  %458 = vmatprep.mubr.bf16.mxu0 %v2839_v6  ;;  %v2557_v8 = vld [vmem:[%s3938_s2 + $0x4] ss:$12 sps:$4 sm:$0xff]   ;;  %v2559_v9 = vld [vmem:[%s3938_s2] ss:$12 sps:$4 sm:$0xff]  }
  0x49   : > { %604 = vmatprep.subr.bf16.mxu1 %v2555_v5  ;;  %v2556_v10 = vld [vmem:[%s3032_s21] sm:$0xff]   ;;  %440 = vmatprep.subr.bf16.mxu0 %v2557_v8  ;;  %v3061_v11 = vld [vmem:[#allocation4 + $0x168] sm:$0xff]  ;;  %v3069_v14 = vld [vmem:[#allocation4 + $0x150] sm:$0xff]  ;;  %vm2841_vm1 = vmmov 0   ;;  %s1173_s13 = scalar_select %p347_p2, 1, 0 }
  0x4a   : > { %441 = vmatpush1.bf16.msra.mxu0 %v2559_v9  ;;  %v2560_v13 = vld [vmem:[%s3938_s2 + $0x20] ss:$12 sps:$4 sm:$0xff]   ;;  %v3076_v16 = vld [vmem:[#allocation4 + $0x138] sm:$0xff]  ;;  %v2561_v19 = vld [vmem:[%s3032_s21 + $0x8] ss:$0 sps:$4 sm:$0xff]   ;;  %s1171_s22 = sadd.s32 2, %s3016_s23 }
  0x4b   : > { %2235 = vmatmul.mubr.msk.bf16.vlgmr.msra.gmra.mxu1 %vm419_vm0, %v2552_v3  ;;  %v3072_v15 = vld [vmem:[#allocation4 + $0x140] sm:$0xff]  ;;  %v3079_v17 = vld [vmem:[#allocation4 + $0x128] sm:$0xff]  ;;  %2238 = vmatprep.subr.bf16.mxu0 %v2560_v13  ;;  %v3086_v20 = vld [vmem:[#allocation4 + $0x110] sm:$0xff]  ;;  %p3614_p12 = scmp.lt.s32.totalorder %s1171_s22, 8  ;;  %s1520_s21 = sadd.s32 1, %s3012_s16 }
  0x4c   : > { %605 = vmatpush1.bf16.msra.mxu1 %v2553_v4  ;;  %622 = vmatprep.mubr.bf16.mxu1 %v2839_v6  ;;  %v3082_v18 = vld [vmem:[#allocation4 + $0x120] sm:$0xff]  ;;  %v3089_v21 = vld [vmem:[#allocation4 + $0x108] sm:$0xff]  ;;  %v3093_v23 = vld [vmem:[#allocation4 + $0xf8] sm:$0xff]  ;;  %p1522_p13 = scmp.lt.s32.totalorder %s1520_s21, 8  ;;  %s1521_s3 = sadd.s32 1, %s3016_s23 }
  0x4d   : > { %845 = vmatprep.subr.mxu1 %v3050_v7  ;;  %2081 = vmatmul.mubr.msk.bf16.vlgmr.msra.gmra.mxu0 %vm419_vm0, %v2551_v2  ;;  %v3096_v24 = vld [vmem:[#allocation4 + $0xf0] sm:$0xff]  ;;  %v3100_v25 = vld [vmem:[#allocation4 + $0xe0] sm:$0xff]  ;;  %v3104_v26 = vld [vmem:[#allocation4 + $0xd8] sm:$0xff]  ;;  %s1178_s24 = scalar_select %p3614_p12, 1, 0 }
  0x4e   : > { %2239 = vmatpush3.bf16.msra.mxu0 %v2560_v13  ;;  %468 = vmatprep.mubr.bf16.mxu0 %v2839_v6  ;;  %v3108_v27 = vld [vmem:[#allocation4 + $0xc8] sm:$0xff]  ;;  %v3112_v28 = vld [vmem:[#allocation4 + $0xc0] sm:$0xff]  ;;  %v3115_v29 = vld [vmem:[#allocation4 + $0xb0] sm:$0xff]  ;;  %s1523_s18 = scalar_select %p1522_p13, 1, 0 }
  0x4f   : > { %2244 = vmatprep.subr.mxu0 %v3994_v22  ;;  %4033 = vst [vmem:[#allocation22_spill] sm:$0xff] %v3108_v27  ;;  %4034 = vst [vmem:[#allocation23_spill] sm:$0xff] %v3112_v28  ;;  %v3118_v30 = vld [vmem:[#allocation4 + $0xa8] sm:$0xff]  ;;  %v3121_v31 = vld [vmem:[#allocation4 + $0x98] sm:$0xff]  ;;  %p3760_p0 = scmp.lt.s32.totalorder %s1521_s3, 8  ;;  %s1870_s25 = sadd.s32 2, %s3012_s16 }
  0x50   : > { %4035 = vst [vmem:[#allocation24_spill] sm:$0xff] %v3115_v29  ;;  %4036 = vst [vmem:[#allocation25_spill] sm:$0xff] %v3118_v30  ;;  %v3123_v32 = vld [vmem:[#allocation4 + $0x178] sm:$0xff]  ;;  %v3126_v33 = vld [vmem:[#allocation4 + $0x90] sm:$0xff]  ;;  %p1871_p1 = scmp.lt.s32.totalorder %s1870_s25, 8  ;;  %s2122_s27 = smul.u32 384, %s2928_s12 }
  0x51   : > { %4037 = vst [vmem:[#allocation26_spill] sm:$0xff] %v3121_v31  ;;  %4038 = vst [vmem:[#allocation27_spill] sm:$0xff] %v3126_v33  ;;  %v3129_v34 = vld [vmem:[#allocation4 + $0x80] sm:$0xff]  ;;  %v3135_v36 = vld [vmem:[#allocation4 + $0x78] sm:$0xff]  ;;  %s1528_s29 = scalar_select %p3760_p0, 1, 0 }
  0x52   : > { %4039 = vst [vmem:[#allocation28_spill] sm:$0xff] %v3129_v34  ;;  %v3132_v35 = vld [vmem:[#allocation4 + $0x160] sm:$0xff]  ;;  %4040 = vst [vmem:[#allocation29_spill] sm:$0xff] %v3135_v36  ;;  %v3139_v37 = vld [vmem:[#allocation4 + $0x68] sm:$0xff]  ;;  %s1872_s10 = scalar_select %p1871_p1, 1, 0 }
  0x53   : > { %2095 = vmatmul.mubr.msk.bf16.vlgmr.msra.gmra.mxu1 %vm419_vm0, %v2556_v10  ;;  %4041 = vst [vmem:[#allocation30_spill] sm:$0xff] %v3139_v37  ;;  %v3142_v38 = vld [vmem:[#allocation4 + $0x148] sm:$0xff]  ;;  %v3145_v39 = vld [vmem:[#allocation4 + $0x60] sm:$0xff]  ;;  %v3149_v40 = vld [vmem:[#allocation4 + $0x50] sm:$0xff]  ;;  %s3809_s17 = scalar_lea.hbm %s3942_s6, %s2122_s27  ;;  %s2842_s3 = smov [#allocation7]  }
  0x54   : > { %846 = vmatpush1.msra.mxu1 %v3061_v11  ;;  %632 = vmatprep.mubr.bf16.mxu1 %v2839_v6  ;;  %4042 = vst [vmem:[#allocation31_spill] sm:$0xff] %v3145_v39  ;;  %4043 = vst [vmem:[#allocation32_spill] sm:$0xff] %v3149_v40  ;;  %v3152_v41 = vld [vmem:[#allocation4 + $0x130] sm:$0xff]  ;;  %v3155_v42 = vld [vmem:[#allocation4 + $0x48] sm:$0xff]  ;;  %s2691_s28 = sshll.u32 %s2842_s3, 4  ;;  %s2692_s28 = int_to_ptr.vmem [resolvable:$false] %s2691_s28 }
  0x55   : > { %847 = vmatprep.subr.mxu1 %v3063_v12  ;;  %2082 = vmatmul.mubr.msk.bf16.gmra.mxu0 %vm419_vm0, %v2552_v3  ;;  %4044 = vst [vmem:[#allocation33_spill] sm:$0xff] %v3155_v42  ;;  %v3159_v43 = vld [vmem:[#allocation4 + $0x38] sm:$0xff]  ;;  %v3165_v45 = vld [vmem:[#allocation4 + $0x30] sm:$0xff]  ;;  %v3169_v46 = vld [vmem:[#allocation4 + $0x20] sm:$0xff] }
  0x56   : > { %848 = vmatpush1.msra.mxu1 %v3069_v14  ;;  %2240 = vmatprep.mubr.msk.bf16.mxu0 %vm419_vm0, %v2556_v10  ;;  %4045 = vst [vmem:[#allocation34_spill] sm:$0xff] %v3159_v43  ;;  %v3162_v44 = vld [vmem:[#allocation4 + $0x118] sm:$0xff]  ;;  %4046 = vst [vmem:[#allocation35_spill] sm:$0xff] %v3165_v45  ;;  %v3172_v47 = vld [vmem:[#allocation4 + $0x100] sm:$0xff] }
  0x57   : > { %849 = vmatprep.subr.mxu1 %v3072_v15  ;;  %4047 = vst [vmem:[#allocation36_spill] sm:$0xff] %v3169_v46  ;;  %v3175_v48 = vld [vmem:[#allocation4 + $0x18] sm:$0xff]  ;;  %v3179_v49 = vld [vmem:[#allocation4 + $0x8] sm:$0xff]  ;;  %v3185_v51 = vld [vmem:[#allocation4] sm:$0xff] }
  0x58   : > { %850 = vmatpush1.msra.mxu1 %v3076_v16  ;;  %4048 = vst [vmem:[#allocation37_spill] sm:$0xff] %v3175_v48  ;;  %4049 = vst [vmem:[#allocation38_spill] sm:$0xff] %v3179_v49  ;;  %v3182_v50 = vld [vmem:[#allocation4 + $0xe8] sm:$0xff]  ;;  %v3189_v52 = vld [vmem:[#allocation10] sm:$0xff] }
  0x59   : > { %851 = vmatprep.subr.mxu1 %v3079_v17  ;;  %4050 = vst [vmem:[#allocation39_spill] sm:$0xff] %v3185_v51  ;;  %v3191_v53 = vld [vmem:[#allocation4 + $0x2f0] sm:$0xff]  ;;  %v3195_v54 = vld [vmem:[#allocation4 + $0x2e8] sm:$0xff]  ;;  %v3201_v56 = vld [vmem:[#allocation4 + $0x2d8] sm:$0xff] }
  0x5a   : > { %852 = vmatpush1.msra.mxu1 %v3082_v18  ;;  %4051 = vst [vmem:[#allocation40_spill] sm:$0xff] %v3191_v53  ;;  %v3198_v55 = vld [vmem:[#allocation4 + $0xd0] sm:$0xff]  ;;  %v3208_v58 = vld [vmem:[#allocation4 + $0xb8] sm:$0xff]  ;;  %v3211_v59 = vld [vmem:[#allocation4 + $0x2c0] sm:$0xff] }
  0x5b   : > { %853 = vmatprep.subr.mxu1 %v3086_v20  ;;  %2096 = vmatmul.mubr.msk.bf16.gmra.mxu1 %vm419_vm0, %v2561_v19  ;;  %4052 = vst [vmem:[#allocation41_spill] sm:$0xff] %v3198_v55  ;;  %v3206_v57 = vld [vmem:[#allocation4 + $0x2d0] sm:$0xff]  ;;  %4053 = vst [vmem:[#allocation42_spill] sm:$0xff] %v3208_v58  ;;  %v3215_v60 = vld [vmem:[#allocation4 + $0x2b8] sm:$0xff] }
  0x5c   : > { %854 = vmatpush1.msra.mxu1 %v3089_v21  ;;  %909 = vmatprep.mubr.f32.mxu1 %v3994_v22  ;;  %4054 = vst [vmem:[#allocation43_spill] sm:$0xff] %v3211_v59  ;;  %4055 = vst [vmem:[#allocation44_spill] sm:$0xff] %v3215_v60  ;;  %v3218_v61 = vld [vmem:[#allocation4 + $0xa0] sm:$0xff]  ;;  %v3221_v62 = vld [vmem:[#allocation4 + $0x2a8] sm:$0xff] }
  0x5d   : > { %855 = vmatprep.subr.mxu1 %v3093_v23  ;;  %2241 = vmatmul.mubr.msk.bf16.vlgmr.msra.gmra.mxu0 %vm419_vm0, %v2561_v19  ;;  %4056 = vst [vmem:[#allocation45_spill] sm:$0xff] %v3218_v61  ;;  %4057 = vst [vmem:[#allocation46_spill] sm:$0xff] %v3221_v62  ;;  %v3225_v63 = vld [vmem:[#allocation4 + $0x2a0] sm:$0xff]  ;;  %v3228_v0 = vld [vmem:[#allocation4 + $0x88] sm:$0xff] }
  0x5e   : > { %856 = vmatpush1.msra.mxu1 %v3096_v24  ;;  %2245 = vmatpush3.msra.mxu0 %v3123_v32  ;;  %4058 = vst [vmem:[#allocation47_spill] sm:$0xff] %v3225_v63  ;;  %4059 = vst [vmem:[#allocation48_spill] sm:$0xff] %v3228_v0  ;;  %v3231_v1 = vld [vmem:[#allocation4 + $0x290] sm:$0xff]  ;;  %v3235_v2 = vld [vmem:[#allocation4 + $0x288] sm:$0xff] }
  0x5f   : > { %857 = vmatprep.subr.mxu1 %v3100_v25  ;;  %2246 = vmatprep.subr.mxu0 %v3994_v22  ;;  %4060 = vst [vmem:[#allocation49_spill] sm:$0xff] %v3231_v1  ;;  %4061 = vst [vmem:[#allocation50_spill] sm:$0xff] %v3235_v2  ;;  %v3238_v3 = vld [vmem:[#allocation4 + $0x70] sm:$0xff]  ;;  %v3241_v4 = vld [vmem:[#allocation4 + $0x278] sm:$0xff] }
  0x60   : > { %858 = vmatpush1.msra.mxu1 %v3104_v26  ;;  %2247 = vmatpush3.msra.mxu0 %v3132_v35  ;;  %4062 = vst [vmem:[#allocation51_spill] sm:$0xff] %v3238_v3  ;;  %4063 = vst [vmem:[#allocation52_spill] sm:$0xff] %v3241_v4  ;;  %v3245_v5 = vld [vmem:[#allocation4 + $0x270] sm:$0xff]  ;;  %v3248_v6 = vld [vmem:[#allocation4 + $0x58] sm:$0xff] }
  0x61   : > { %859 = vmatprep.subr.mxu1 %v3108_v27  ;;  %2248 = vmatprep.subr.mxu0 %v3994_v22  ;;  %4064 = vst [vmem:[#allocation53_spill] sm:$0xff] %v3245_v5  ;;  %4065 = vst [vmem:[#allocation54_spill] sm:$0xff] %v3248_v6  ;;  %v3251_v8 = vld [vmem:[#allocation4 + $0x260] sm:$0xff]  ;;  %v3255_v9 = vld [vmem:[#allocation4 + $0x258] sm:$0xff] }
  0x62   : > { %860 = vmatpush1.msra.mxu1 %v3112_v28  ;;  %2249 = vmatpush3.msra.mxu0 %v3142_v38  ;;  %4066 = vst [vmem:[#allocation55_spill] sm:$0xff] %v3251_v8  ;;  %4067 = vst [vmem:[#allocation56_spill] sm:$0xff] %v3255_v9  ;;  %v3258_v10 = vld [vmem:[#allocation4 + $0x40] sm:$0xff]  ;;  %v3261_v13 = vld [vmem:[#allocation4 + $0x248] sm:$0xff] }
  0x63   : > { %861 = vmatprep.subr.mxu1 %v3115_v29  ;;  %2250 = vmatprep.subr.mxu0 %v3994_v22  ;;  %4068 = vst [vmem:[#allocation57_spill] sm:$0xff] %v3258_v10  ;;  %4069 = vst [vmem:[#allocation58_spill] sm:$0xff] %v3261_v13  ;;  %v3265_v19 = vld [vmem:[#allocation4 + $0x240] sm:$0xff] }
  0x64   : > { %862 = vmatpush1.msra.mxu1 %v3118_v30  ;;  %2251 = vmatpush3.msra.mxu0 %v3152_v41  ;;  %4070 = vst [vmem:[#allocation59_spill] sm:$0xff] %v3265_v19 }
  0x65   : > { %863 = vmatprep.subr.mxu1 %v3121_v31  ;;  %2252 = vmatprep.subr.mxu0 %v3994_v22 }
  0x66   : > { %864 = vmatpush1.msra.mxu1 %v3126_v33  ;;  %2253 = vmatpush3.msra.mxu0 %v3162_v44 }
  0x67   : > { %865 = vmatprep.subr.mxu1 %v3129_v34  ;;  %2254 = vmatprep.subr.mxu0 %v3994_v22 }
  0x68   : > { %866 = vmatpush1.msra.mxu1 %v3135_v36  ;;  %2255 = vmatpush3.msra.mxu0 %v3172_v47 }
  0x69   : > { %867 = vmatprep.subr.mxu1 %v3139_v37  ;;  %2256 = vmatprep.subr.mxu0 %v3994_v22 }
  0x6a   : > { %868 = vmatpush1.msra.mxu1 %v3145_v39  ;;  %2257 = vmatpush3.msra.mxu0 %v3182_v50 }
  0x6b   : > { %869 = vmatprep.subr.mxu1 %v3149_v40  ;;  %2258 = vmatprep.subr.mxu0 %v3994_v22 }
  0x6c   : > { %870 = vmatpush1.msra.mxu1 %v3155_v42  ;;  %2259 = vmatpush3.msra.mxu0 %v3198_v55 }
  0x6d   : > { %871 = vmatprep.subr.mxu1 %v3159_v43  ;;  %2260 = vmatprep.subr.mxu0 %v3994_v22 }
  0x6e   : > { %872 = vmatpush1.msra.mxu1 %v3165_v45  ;;  %2261 = vmatpush3.msra.mxu0 %v3208_v58 }
  0x6f   : > { %873 = vmatprep.subr.mxu1 %v3169_v46  ;;  %2262 = vmatprep.subr.mxu0 %v3994_v22 }
  0x70   : > { %874 = vmatpush1.msra.mxu1 %v3175_v48  ;;  %2263 = vmatpush3.msra.mxu0 %v3218_v61 }
  0x71   : > { %875 = vmatprep.subr.mxu1 %v3179_v49  ;;  %2264 = vmatprep.subr.mxu0 %v3994_v22 }
  0x72   : > { %876 = vmatpush1.msra.mxu1 %v3185_v51  ;;  %2265 = vmatpush3.msra.mxu0 %v3228_v0 }
  0x73   : > { %910 = vmatmul.mubr.f32.vlgmr.msra.gmra.mxu1 %v3189_v52  ;;  %986 = vmatprep.subr.mxu1 %v3191_v53 }
  0x74   : > { %987 = vmatpush1.msra.mxu1 %v3195_v54  ;;  %2266 = vmatprep.subr.mxu0 %v3994_v22 }
  0x75   : > { %988 = vmatprep.subr.mxu1 %v3201_v56  ;;  %2267 = vmatpush3.msra.mxu0 %v3238_v3 }
  0x76   : > { %989 = vmatpush1.msra.mxu1 %v3206_v57  ;;  %2268 = vmatprep.subr.mxu0 %v3994_v22 }
  0x77   : > { %990 = vmatprep.subr.mxu1 %v3211_v59  ;;  %2269 = vmatpush3.msra.mxu0 %v3248_v6  ;;  %v3331_v59 = vld [vmem:[#allocation4 + $0x2b0] sm:$0xff] }
  0x78   : > { %991 = vmatpush1.msra.mxu1 %v3215_v60  ;;  %2270 = vmatprep.subr.mxu0 %v3994_v22  ;;  %v3321_v60 = vld [vmem:[#allocation4 + $0x2c8] sm:$0xff] }
  0x79   : > { %992 = vmatprep.subr.mxu1 %v3221_v62  ;;  %2271 = vmatpush3.msra.mxu0 %v3258_v10  ;;  %v3314_v62 = vld [vmem:[#allocation4 + $0x1c8] sm:$0xff]  ;;  %4085 = vst [vmem:[#allocation74_spill] sm:$0xff] %v3321_v60 }
  0x7a   : > { %993 = vmatpush1.msra.mxu1 %v3225_v63  ;;  %2272 = vmatprep.subr.mxu0 %v3994_v22  ;;  %v3297_v63 = vld [vmem:[#allocation4 + $0x1e8] sm:$0xff]  ;;  %4083 = vst [vmem:[#allocation72_spill] sm:$0xff] %v3314_v62 }
  0x7b   : > { %994 = vmatprep.subr.mxu1 %v3231_v1  ;;  %v3282_v1 = vld [vmem:[#allocation4 + $0x10] sm:$0xff]  ;;  %1050 = vmatprep.mubr.f32.mxu1 %v3994_v22  ;;  %4079 = vst [vmem:[#allocation68_spill] sm:$0xff] %v3297_v63 }
  0x7c   : > { %995 = vmatpush1.msra.mxu1 %v3235_v2  ;;  %v3268_v2 = vld [vmem:[#allocation4 + $0x28] sm:$0xff]  ;;  %4075 = vst [vmem:[#allocation64_spill] sm:$0xff] %v3282_v1  ;;  %2276 = vmatprep.mubr.msk.f32.mxu0 %vm2841_vm1, %v3994_v22 }
  0x7d   : > { %996 = vmatprep.subr.mxu1 %v3241_v4  ;;  %4071 = vst [vmem:[#allocation60_spill] sm:$0xff] %v3268_v2  ;;  %v3271_v4 = vld [vmem:[#allocation4 + $0x230] sm:$0xff]  ;;  %2273 = vmatpush3.msra.mxu0 %v3268_v2 }
  0x7e   : > { %997 = vmatpush1.msra.mxu1 %v3245_v5  ;;  %4072 = vst [vmem:[#allocation61_spill] sm:$0xff] %v3271_v4  ;;  %v3275_v5 = vld [vmem:[#allocation4 + $0x228] sm:$0xff]  ;;  %2274 = vmatprep.subr.mxu0 %v3994_v22 }
  0x7f   : > { %998 = vmatprep.subr.mxu1 %v3251_v8  ;;  %4073 = vst [vmem:[#allocation62_spill] sm:$0xff] %v3275_v5  ;;  %v3279_v8 = vld [vmem:[#allocation4 + $0x218] sm:$0xff]  ;;  %2275 = vmatpush3.msra.mxu0 %v3282_v1 }
  0x80   : > { %999 = vmatpush1.msra.mxu1 %v3255_v9  ;;  %4074 = vst [vmem:[#allocation63_spill] sm:$0xff] %v3279_v8  ;;  %v3285_v9 = vld [vmem:[#allocation4 + $0x210] sm:$0xff]  ;;  %2279 = vmatprep.subr.mxu0 %v3994_v22 }
  0x81   : > { %1000 = vmatprep.subr.mxu1 %v3261_v13  ;;  %4076 = vst [vmem:[#allocation65_spill] sm:$0xff] %v3285_v9  ;;  %v3289_v13 = vld [vmem:[#allocation4 + $0x200] sm:$0xff]  ;;  %2277 = vmatmul.mubr.f32.vlgmr.msra.gmra.mxu0 %v3189_v52 }
  0x82   : > { %1001 = vmatpush1.msra.mxu1 %v3265_v19  ;;  %4077 = vst [vmem:[#allocation66_spill] sm:$0xff] %v3289_v13  ;;  %v3293_v19 = vld [vmem:[#allocation4 + $0x1f8] sm:$0xff]  ;;  %2311 = vmatprep.mubr.msk.f32.mxu0 %vm2841_vm1, %v3994_v22 }
  0x83   : > { %1002 = vmatprep.subr.mxu1 %v3271_v4  ;;  %4078 = vst [vmem:[#allocation67_spill] sm:$0xff] %v3293_v19  ;;  %v3301_v4 = vld [vmem:[#allocation4 + $0x2f8] sm:$0xff] }
  0x84   : > { %1003 = vmatpush1.msra.mxu1 %v3275_v5  ;;  %v3304_v5 = vld [vmem:[#allocation4 + $0x1e0] sm:$0xff]  ;;  %2280 = vmatpush3.msra.mxu0 %v3301_v4 }
  0x85   : > { %1004 = vmatprep.subr.mxu1 %v3279_v8  ;;  %4080 = vst [vmem:[#allocation69_spill] sm:$0xff] %v3304_v5  ;;  %v3308_v8 = vld [vmem:[#allocation4 + $0x1d0] sm:$0xff]  ;;  %2281 = vmatprep.subr.mxu0 %v3994_v22 }
  0x86   : > { %1005 = vmatpush1.msra.mxu1 %v3285_v9  ;;  %4081 = vst [vmem:[#allocation70_spill] sm:$0xff] %v3308_v8  ;;  %v3311_v9 = vld [vmem:[#allocation4 + $0x2e0] sm:$0xff] }
  0x87   : > { %1006 = vmatprep.subr.mxu1 %v3289_v13  ;;  %4082 = vst [vmem:[#allocation71_spill] sm:$0xff] %v3311_v9  ;;  %v3318_v13 = vld [vmem:[#allocation4 + $0x1b8] sm:$0xff]  ;;  %2282 = vmatpush3.msra.mxu0 %v3311_v9 }
  0x88   : > { %1007 = vmatpush1.msra.mxu1 %v3293_v19  ;;  %4084 = vst [vmem:[#allocation73_spill] sm:$0xff] %v3318_v13  ;;  %v3324_v19 = vld [vmem:[#allocation4 + $0x1b0] sm:$0xff]  ;;  %2283 = vmatprep.subr.mxu0 %v3994_v22  ;;  %v3341_v9 = vld [vmem:[#allocation4 + $0x298] sm:$0xff] }
  0x89   : > { %1008 = vmatprep.subr.mxu1 %v3297_v63  ;;  %v3328_v63 = vld [vmem:[#allocation4 + $0x1a0] sm:$0xff]  ;;  %2284 = vmatpush3.msra.mxu0 %v3321_v60 }
  0x8a   : > { %1009 = vmatpush1.msra.mxu1 %v3304_v5  ;;  %4086 = vst [vmem:[#allocation75_spill] sm:$0xff] %v3328_v63  ;;  %v3334_v5 = vld [vmem:[#allocation4 + $0x198] sm:$0xff]  ;;  %2285 = vmatprep.subr.mxu0 %v3994_v22  ;;  %v3351_v60 = vld [vmem:[#allocation4 + $0x280] sm:$0xff] }
  0x8b   : > { %1010 = vmatprep.subr.mxu1 %v3308_v8  ;;  %4087 = vst [vmem:[#allocation76_spill] sm:$0xff] %v3334_v5  ;;  %v3338_v8 = vld [vmem:[#allocation4 + $0x188] sm:$0xff]  ;;  %2286 = vmatpush3.msra.mxu0 %v3331_v59 }
  0x8c   : > { %1011 = vmatpush1.msra.mxu1 %v3314_v62  ;;  %4088 = vst [vmem:[#allocation77_spill] sm:$0xff] %v3338_v8  ;;  %v3344_v62 = vld [vmem:[#allocation4 + $0x180] sm:$0xff]  ;;  %2287 = vmatprep.subr.mxu0 %v3994_v22 }
  0x8d   : > { %1012 = vmatprep.subr.mxu1 %v3318_v13  ;;  %4089 = vst [vmem:[#allocation78_spill] sm:$0xff] %v3344_v62  ;;  %v3348_v13 = vld [vmem:[#allocation10 + $0x8] sm:$0xff]  ;;  %2288 = vmatpush3.msra.mxu0 %v3341_v9 }
  0x8e   : > { %1013 = vmatpush1.msra.mxu1 %v3324_v19  ;;  %2289 = vmatprep.subr.mxu0 %v3994_v22 }
  0x8f   : > { %1014 = vmatprep.subr.mxu1 %v3328_v63  ;;  %v3357_v63 = vld [vmem:[#allocation4 + $0x268] sm:$0xff]  ;;  %2290 = vmatpush3.msra.mxu0 %v3351_v60 }
  0x90   : > { %1015 = vmatpush1.msra.mxu1 %v3334_v5  ;;  %2291 = vmatprep.subr.mxu0 %v3994_v22  ;;  %v3362_v5 = vld [vmem:[#allocation4 + $0x250] sm:$0xff] }
  0x91   : > { %1016 = vmatprep.subr.mxu1 %v3338_v8  ;;  %2292 = vmatpush3.msra.mxu0 %v3357_v63  ;;  %v3375_v8 = vld [vmem:[#allocation4 + $0x220] sm:$0xff] }
  0x92   : > { %1017 = vmatpush1.msra.mxu1 %v3344_v62  ;;  %2293 = vmatprep.subr.mxu0 %v3994_v22  ;;  %v3369_v62 = vld [vmem:[#allocation4 + $0x238] sm:$0xff] }
  0x93   : > { %1051 = vmatmul.mubr.f32.vlgmr.msra.gmra.mxu1 %v3348_v13  ;;  %1196 = vmatprep.subr.mxu1 %v3050_v7  ;;  %v3381_v7 = vld [vmem:[#allocation4 + $0x208] sm:$0xff] }
  0x94   : > { %1197 = vmatpush1.msra.mxu1 %v3061_v11  ;;  %2294 = vmatpush3.msra.mxu0 %v3362_v5  ;;  %v3387_v11 = vld [vmem:[#allocation4 + $0x1f0] sm:$0xff] }
  0x95   : > { %1198 = vmatprep.subr.mxu1 %v3063_v12  ;;  %2295 = vmatprep.subr.mxu0 %v3994_v22  ;;  %v3393_v12 = vld [vmem:[#allocation4 + $0x1d8] sm:$0xff] }
  0x96   : > { %1199 = vmatpush1.msra.mxu1 %v3069_v14  ;;  %2296 = vmatpush3.msra.mxu0 %v3369_v62  ;;  %v3399_v14 = vld [vmem:[#allocation4 + $0x1c0] sm:$0xff] }
  0x97   : > { %1200 = vmatprep.subr.mxu1 %v3072_v15  ;;  %2297 = vmatprep.subr.mxu0 %v3994_v22  ;;  %v3405_v15 = vld [vmem:[#allocation4 + $0x1a8] sm:$0xff] }
  0x98   : > { %1201 = vmatpush1.msra.mxu1 %v3076_v16  ;;  %2298 = vmatpush3.msra.mxu0 %v3375_v8  ;;  %v3411_v16 = vld [vmem:[#allocation4 + $0x190] sm:$0xff] }
  0x99   : > { %1202 = vmatprep.subr.mxu1 %v3079_v17  ;;  %2299 = vmatprep.subr.mxu0 %v3994_v22  ;;  %v380_v17 = vlaneseq }
  0x9a   : > { %1203 = vmatpush1.msra.mxu1 %v3082_v18  ;;  %2300 = vmatpush3.msra.mxu0 %v3381_v7 }
  0x9b   : > { %1204 = vmatprep.subr.mxu1 %v3086_v20  ;;  %2301 = vmatprep.subr.mxu0 %v3994_v22  ;;  %v381_v18 = vshrl.u32 %v380_v17, 7  ;;  %v2089_v17 = vld [vmem:[%s3940_s4 + $0x3] sm:$0x7] }
  0x9c   : > { %1205 = vmatpush1.msra.mxu1 %v3089_v21  ;;  %2302 = vmatpush3.msra.mxu0 %v3387_v11 }
  0x9d   : > { %1206 = vmatprep.subr.mxu1 %v3093_v23  ;;  %2303 = vmatprep.subr.mxu0 %v3994_v22 }
  0x9e   : > { %1207 = vmatpush1.msra.mxu1 %v3096_v24  ;;  %2304 = vmatpush3.msra.mxu0 %v3393_v12 }
  0x9f   : > { %1208 = vmatprep.subr.mxu1 %v3100_v25  ;;  %2305 = vmatprep.subr.mxu0 %v3994_v22 }
  0xa0   : > { %1209 = vmatpush1.msra.mxu1 %v3104_v26  ;;  %2306 = vmatpush3.msra.mxu0 %v3399_v14 }
  0xa1   : > { %1210 = vmatprep.subr.mxu1 %v3108_v27  ;;  %2307 = vmatprep.subr.mxu0 %v3994_v22 }
  0xa2   : > { %1211 = vmatpush1.msra.mxu1 %v3112_v28  ;;  %2308 = vmatpush3.msra.mxu0 %v3405_v15 }
  0xa3   : > { %1212 = vmatprep.subr.mxu1 %v3115_v29  ;;  %2309 = vmatprep.subr.mxu0 %v3994_v22 }
  0xa4   : > { %1213 = vmatpush1.msra.mxu1 %v3118_v30  ;;  %2310 = vmatpush3.msra.mxu0 %v3411_v16 }
  0xa5   : > { %1214 = vmatprep.subr.mxu1 %v3121_v31  ;;  %2312 = vmatmul.mubr.f32.vlgmr.msra.gmra.mxu0 %v3348_v13 }
  0xa6   : > { %2314 = vmatprep.subr.mxu0 %v3994_v22  ;;  %1215 = vmatpush1.msra.mxu1 %v3126_v33 }
  0xa7   : > { %2315 = vmatpush3.msra.mxu0 %v3123_v32  ;;  %1216 = vmatprep.subr.mxu1 %v3129_v34 }
  0xa8   : > { %2316 = vmatprep.subr.mxu0 %v3994_v22  ;;  %1217 = vmatpush1.msra.mxu1 %v3135_v36 }
  0xa9   : > { %2317 = vmatpush3.msra.mxu0 %v3132_v35  ;;  %1218 = vmatprep.subr.mxu1 %v3139_v37 }
  0xaa   : > { %2318 = vmatprep.subr.mxu0 %v3994_v22  ;;  %1219 = vmatpush1.msra.mxu1 %v3145_v39 }
  0xab   : > { %2319 = vmatpush3.msra.mxu0 %v3142_v38  ;;  %1220 = vmatprep.subr.mxu1 %v3149_v40 }
  0xac   : > { %2320 = vmatprep.subr.mxu0 %v3994_v22  ;;  %1221 = vmatpush1.msra.mxu1 %v3155_v42 }
  0xad   : > { %2321 = vmatpush3.msra.mxu0 %v3152_v41  ;;  %1222 = vmatprep.subr.mxu1 %v3159_v43 }
  0xae   : > { %2322 = vmatprep.subr.mxu0 %v3994_v22  ;;  %1223 = vmatpush1.msra.mxu1 %v3165_v45 }
  0xaf   : > { %2323 = vmatpush3.msra.mxu0 %v3162_v44  ;;  %1224 = vmatprep.subr.mxu1 %v3169_v46  ;;  %v3482_v46 = vsub.s32 0, %v381_v18 }
  0xb0   : > { %2324 = vmatprep.subr.mxu0 %v3994_v22  ;;  %1225 = vmatpush1.msra.mxu1 %v3175_v48 }
  0xb1   : > { %2325 = vmatpush3.msra.mxu0 %v3172_v47  ;;  %1226 = vmatprep.subr.mxu1 %v3179_v49  ;;  %v3492_v45 = vrot.slane %v2089_v17, %v3482_v46 }
  0xb2   : > { %2326 = vmatprep.subr.mxu0 %v3994_v22  ;;  %1227 = vmatpush1.msra.mxu1 %v3185_v51  ;;  %v378_v51 = vld [vmem:[%s3940_s4] sm:$0x7] }
  0xb3   : > { %2327 = vmatpush3.msra.mxu0 %v3182_v50  ;;  %1260 = vmatprep.mubr.f32.mxu1 %v3994_v22 }
  0xb4   : > { %2328 = vmatprep.subr.mxu0 %v3994_v22  ;;  %2346 = vmatprep.mubr.msk.f32.mxu0 %vm2841_vm1, %v3994_v22 }
  0xb5   : > { %2329 = vmatpush3.msra.mxu0 %v3198_v55  ;;  %1337 = vmatprep.subr.mxu1 %v3191_v53  ;;  %v3471_v53 = vsub.s32 2, %v381_v18 }
  0xb6   : > { %2330 = vmatprep.subr.mxu0 %v3994_v22 }
  0xb7   : > { %2331 = vmatpush3.msra.mxu0 %v3208_v58  ;;  %v3477_v49 = vrot.slane %v378_v51, %v3471_v53 }
  0xb8   : > { %2332 = vmatprep.subr.mxu0 %v3994_v22 }
  0xb9   : > { %2333 = vmatpush3.msra.mxu0 %v3218_v61 }
  0xba   : > { %2334 = vmatprep.subr.mxu0 %v3994_v22 }
  0xbb   : > { %2335 = vmatpush3.msra.mxu0 %v3228_v0 }
  0xbc   : > { %2336 = vmatprep.subr.mxu0 %v3994_v22 }
  0xbd   : > { %2337 = vmatpush3.msra.mxu0 %v3238_v3 }
  0xbe   : > { %2338 = vmatprep.subr.mxu0 %v3994_v22 }
  0xbf   : > { %2339 = vmatpush3.msra.mxu0 %v3248_v6 }
  0xc0   : > { %2340 = vmatprep.subr.mxu0 %v3994_v22 }
  0xc1   : > { %2341 = vmatpush3.msra.mxu0 %v3258_v10 }
  0xc2   : > { %2342 = vmatprep.subr.mxu0 %v3994_v22 }
  0xc3   : > { %2343 = vmatpush3.msra.mxu0 %v3268_v2 }
  0xc4   : > { %2344 = vmatprep.subr.mxu0 %v3994_v22 }
  0xc5   : > { %2345 = vmatpush3.msra.mxu0 %v3282_v1 }
  0xc6   : > { %2349 = vmatprep.subr.mxu0 %v3994_v22  ;;  %v3489_v22 = vsub.s32 1, %v381_v18  ;;  %v383_v18 = vrot.slane %v378_v51, %v3482_v46 }
  0xc8   : > { %v387_v0 = vrot.slane %v378_v51, %v3489_v22 }
 0x10b   : > { %v2236_v48 = vpop.f32.mrf.mxu1 }
 0x10c   : > { %v3480_v2 = vadd.f32 %v2236_v48, %v3477_v49  ;;  %v3498_v48 = vrot.slane %v2089_v17, %v3489_v22 }
 0x10d   : > { %v3484_v1 = vpop.f32.mrf.mxu1  ;;  %v460_v40 = vpop.f32.mrf.mxu0 }
 0x10e   : > { %4090 = vst [vmem:[#allocation79_spill] sm:$0xff] %v3480_v2 }
 0x10f   : > { %v2237_v10 = vpop.f32.mrf.mxu1  ;;  %v462_v39 = vpop.f32.mrf.mxu0 }
 0x111   : > { %v514_v43 = vpop.f32.mrf.mxu1 }
 0x112   : > { %v3495_v6 = vadd.f32 %v514_v43, %v3477_v49 }
 0x113   : > { %v624_v2 = vpop.f32.mrf.mxu1 }
 0x114   : > { %4091 = vst [vmem:[#allocation80_spill] sm:$0xff] %v3495_v6  ;;  %v3501_v42 = vadd.f32 %v624_v2, %v3492_v45  ;;  %v464_v6 = vpop.f32.mrf.mxu0 }
 0x115   : > { %v626_v3 = vpop.f32.mrf.mxu1  ;;  %v3511_v34 = vadd.f32 %v464_v6, %v383_v18  ;;  %v3523_v6 = vrot.slane %v2089_v17, %v3471_v53  ;;  %v461_v17 = vadd.f32 %v460_v40, %v383_v18 }
 0x116   : > { %4092 = vst [vmem:[#allocation81_spill] sm:$0xff] %v3501_v42  ;;  %v3505_v10 = vadd.f32 %v626_v3, %v3498_v48  ;;  %v466_v42 = vpop.f32.mrf.mxu0 }
 0x117   : > { %v628_v37 = vpop.f32.mrf.mxu1  ;;  %4095 = vst [vmem:[#allocation84_spill] sm:$0xff] %v3511_v34  ;;  %v3516_v61 = vadd.f32 %v466_v42, %v387_v0 }
 0x118   : > { %4093 = vst [vmem:[#allocation82_spill] sm:$0xff] %v3505_v10  ;;  %v3509_v43 = vadd.f32 %v628_v37, %v3492_v45  ;;  %v470_v3 = vpop.f32.mrf.mxu0 }
 0x119   : > { %v630_v36 = vpop.f32.mrf.mxu1  ;;  %4097 = vst [vmem:[#allocation86_spill] sm:$0xff] %v3516_v61  ;;  %v3518_v10 = vadd.f32 %v470_v3, %v383_v18  ;;  %v2099_v18 = vld [vmem:[%s3941_s5 + $0x3] sm:$0x7] }
 0x11a   : > { %4094 = vst [vmem:[#allocation83_spill] sm:$0xff] %v3509_v43  ;;  %v3514_v2 = vadd.f32 %v630_v36, %v3498_v48  ;;  %v472_v58 = vpop.f32.mrf.mxu0 }
 0x11b   : > { %v634_v33 = vpop.f32.mrf.mxu1  ;;  %4098 = vst [vmem:[#allocation87_spill] sm:$0xff] %v3518_v10  ;;  %v3520_v51 = vadd.f32 %v472_v58, %v387_v0  ;;  %v795_v58 = vld [vmem:[%s3941_s5] sm:$0x7] }
 0x11c   : > { %4096 = vst [vmem:[#allocation85_spill] sm:$0xff] %v3514_v2  ;;  %v474_v43 = vpop.f32.mrf.mxu0 }
 0x11d   : > { %v636_v31 = vpop.f32.mrf.mxu1  ;;  %4099 = vst [vmem:[#allocation88_spill] sm:$0xff] %v3520_v51  ;;  %v463_v51 = vadd.f32 %v462_v39, %v387_v0 }
 0x11e   : > { %v475_v29 = vpop.f32.mrf.mxu0 }
 0x11f   : > { %v638_v37 = vpop.f32.mrf.mxu1  ;;  %v3537_v29 = vrot.slane %v795_v58, %v3482_v46 }
 0x120   : > { %v3525_v36 = vpop.f32.mrf.mxu0  ;;  %v3541_v37 = vrot.slane %v795_v58, %v3489_v22 }
 0x121   : > { %v639_v30 = vpop.f32.mrf.mxu1 }
 0x122   : > { %v675_v2 = vpop.f32.mrf.mxu0 }
 0x123   : > { %v3528_v42 = vadd.f32 %v675_v2, %v3523_v6 }
 0x124   : > { %v2243_v61 = vpop.f32.mrf.mxu0 }
 0x125   : > { %4100 = vst [vmem:[#allocation89_spill] sm:$0xff] %v3528_v42 }
 0x126   : > { %v678_v3 = vpop.f32.mrf.mxu0 }
 0x127   : > { %v3531_v10 = vadd.f32 %v678_v3, %v3523_v6 }
 0x129   : > { %4101 = vst [vmem:[#allocation90_spill] sm:$0xff] %v3531_v10 }
 0x133   : > { %v911_v30 = vpop.f32.mrf.mxu1 }
 0x134   : > { %v912_v43 = vadd.f32 %v911_v30, %v3537_v29  ;;  %v3548_v30 = vrot.slane %v2099_v18, %v3482_v46 }
 0x135   : > { %v913_v2 = vpop.f32.mrf.mxu1 }
 0x136   : > { %v1127_v61 = vadd.f32 %v912_v43, %v461_v17  ;;  %v914_v3 = vadd.f32 %v913_v2, %v3541_v37  ;;  %v3551_v17 = vrot.slane %v795_v58, %v3471_v53  ;;  %v512_v58 = vadd.f32 %v3484_v1, %v3477_v49 }
 0x137   : > { %v1174_v1 = vstv %s1173_s13  ;;  %s1905_s13 = sshll.u32 %s3034_s14, 4  ;;  %s3811_s13 = int_to_ptr.vmem [resolvable:$true] %s1905_s13 }
 0x138   : > { %v2100_v42 = vmul.f32 -1.442695, %v1127_v61  ;;  %v1134_v10 = vadd.f32 %v914_v3, %v463_v51  ;;  %v637_v3 = vadd.f32 %v636_v31, %v3498_v48  ;;  %vm1175_vm2 = vcmp.eq.s32.totalorder %v1174_v1, 1  ;;  %v4116_v1 = vld [vmem:[#allocation59_spill] sm:$0xff]  ;;  %p2694_p4 = scmp.lt.s32.totalorder %s3811_s13, %s2692_s28 }
 0x13a   : > { %2562 = vpow2.f32 %v2100_v42  ;;  %v2101_v34 = vmul.f32 -1.442695, %v1134_v10  ;;  %v3554_v10 = vrot.slane %v2099_v18, %v3489_v22 }
 0x13c   : > { %2564 = vpow2.f32 %v2101_v34  ;;  %v635_v34 = vadd.f32 %v634_v33, %v3492_v45 }
 0x141   : > { %v982_v27 = vpop.f32.mrf.mxu0 }
 0x142   : > { %v983_v51 = vadd.f32 %v982_v27, %v3551_v17 }
 0x143   : > { %v2278_v40 = vpop.f32.mrf.mxu0 }
 0x147   : > { %v2563_v55 = vpop.eup %2562 }
 0x148   : > { %v1131_v28 = vadd.f32 1.0, %v2563_v55 }
 0x149   : > { %v2565_v39 = vpop.eup %2564 }
 0x14a   : > { %2566 = vrcp.f32 %v1131_v28  ;;  %v1138_v55 = vadd.f32 1.0, %v2565_v39 }
 0x14c   : > { %2568 = vrcp.f32 %v1138_v55 }
 0x153   : > { %v1052_v0 = vpop.f32.mrf.mxu1 }
 0x154   : > { %v1053_v28 = vadd.f32 %v1052_v0, %v3548_v30 }
 0x155   : > { %v1054_v42 = vpop.f32.mrf.mxu1 }
 0x156   : > { %v1148_v43 = vadd.f32 %v1053_v28, %v635_v34  ;;  %v1055_v22 = vadd.f32 %v1054_v42, %v3554_v10 }
 0x157   : > { %v2567_v46 = vpop.eup %2566 }
 0x158   : > { %v2102_v2 = vmul.f32 -1.442695, %v1148_v43  ;;  %v1141_v61 = vmul.f32 %v2567_v46, %v983_v51  ;;  %v1155_v45 = vadd.f32 %v1055_v22, %v637_v3  ;;  %v3576_v43 = vrot.slane %v2099_v18, %v3471_v53  ;;  %v4105_v22 = vld [vmem:[#allocation44_spill] sm:$0xff]  ;;  %v4106_v53 = vld [vmem:[#allocation74_spill] sm:$0xff]  ;;  %v4109_v3 = vld [vmem:[#allocation49_spill] sm:$0xff] }
 0x159   : > { %v2569_v27 = vpop.eup %2568  ;;  %v4107_v18 = vld [vmem:[#allocation46_spill] sm:$0xff] }
 0x15a   : > { %2570 = vpow2.f32 %v2102_v2  ;;  %v1142_v33 = vadd.f32 %v1141_v61, %v512_v58  ;;  %v2103_v40 = vmul.f32 -1.442695, %v1155_v45  ;;  %v1144_v49 = vsub.f32 1.0, %v2569_v27  ;;  %v4104_v2 = vld [vmem:[#allocation43_spill] sm:$0xff] }
 0x15b   : > { %v1146_v31 = vmul.f32 %v2569_v27, %v3189_v52  ;;  %v4102_v58 = vmov 0.0   ;;  %v4111_v27 = vld [vmem:[#allocation52_spill] sm:$0xff] }
 0x15c   : > { %2572 = vtanh.f32 %v1142_v33  ;;  %v684_v33 = vadd.f32 %v3525_v36, %v3523_v6  ;;  %v4114_v6 = vld [vmem:[#allocation56_spill] sm:$0xff]  ;;  %v4115_v36 = vld [vmem:[#allocation58_spill] sm:$0xff] }
 0x15d   : > { %2574 = vpow2.f32 %v2103_v40  ;;  %v4110_v40 = vld [vmem:[#allocation50_spill] sm:$0xff] }
 0x165   : > { %v1123_v34 = vpop.f32.mrf.mxu0 }
 0x167   : > { %v2571_v39 = vpop.eup %2570  ;;  %v2313_v48 = vpop.f32.mrf.mxu0 }
 0x168   : > { %v1152_v0 = vadd.f32 1.0, %v2571_v39  ;;  %v4122_v48 = vld [vmem:[#allocation66_spill] sm:$0xff] }
 0x169   : > { %v2573_v55 = vpop.eup %2572 }
 0x16a   : > { %2576 = vrcp.f32 %v1152_v0  ;;  %v1145_v28 = vmul.f32 %v2573_v55, %v1144_v49  ;;  %v2575_v46 = vpop.eup %2574  ;;  %v4112_v0 = vld [vmem:[#allocation53_spill] sm:$0xff]  ;;  %v4113_v49 = vld [vmem:[#allocation55_spill] sm:$0xff]  ;;  %v4118_v55 = vld [vmem:[#allocation62_spill] sm:$0xff] }
 0x16b   : > { %v1159_v61 = vadd.f32 1.0, %v2575_v46 }
 0x16c   : > { %v1147_v51 = vadd.f32 %v1146_v31, %v1145_v28  ;;  %v4120_v28 = vld [vmem:[#allocation63_spill] sm:$0xff]  ;;  %v4121_v31 = vld [vmem:[#allocation65_spill] sm:$0xff] }
 0x16d   : > { %2578 = vrcp.f32 %v1159_v61  ;;  %v4125_v61 = vld [vmem:[#allocation69_spill] sm:$0xff] }
 0x16e   : > { %v3567_v42 = vsel %vm1175_vm2, %v1147_v51, %v3189_v52  ;;  %v4103_v52 = vld [vmem:[#allocation71_spill] sm:$0xff] }
 0x16f   : > { %1182 = vst [vmem:[%s3034_s14] sm:$0xff] %v3567_v42  ;;  %1261 = vmatmul.mubr.f32.vlgmr.msra.gmra.mxu1 %v3567_v42  ;;  %2347 = vmatmul.mubr.f32.vlgmr.msra.gmra.mxu0 %v3567_v42  ;;  %v4123_v51 = vld [vmem:[#allocation67_spill] sm:$0xff] }
 0x170   : > { %1338 = vmatpush1.msra.mxu1 %v3195_v54  ;;  %2350 = vmatpush3.msra.mxu0 %v3301_v4  ;;  %v1124_v54 = vadd.f32 %v1123_v34, %v3576_v43  ;;  %v4117_v34 = vld [vmem:[#allocation61_spill] sm:$0xff] }
 0x171   : > { %1339 = vmatprep.subr.mxu1 %v3201_v56  ;;  %2351 = vmatprep.subr.mxu0 %v4102_v58  ;;  %v4108_v56 = vld [vmem:[#allocation47_spill] sm:$0xff] }
 0x172   : > { %1340 = vmatpush1.msra.mxu1 %v3206_v57  ;;  %2352 = vmatpush3.msra.mxu0 %v4103_v52 }
 0x173   : > { %1341 = vmatprep.subr.mxu1 %v4104_v2  ;;  %2353 = vmatprep.subr.mxu0 %v4102_v58  ;;  %v4124_v2 = vld [vmem:[#allocation68_spill] sm:$0xff] }
 0x174   : > { %1342 = vmatpush1.msra.mxu1 %v4105_v22  ;;  %2354 = vmatpush3.msra.mxu0 %v4106_v53  ;;  %v4127_v22 = vld [vmem:[#allocation72_spill] sm:$0xff] }
 0x175   : > { %1343 = vmatprep.subr.mxu1 %v4107_v18  ;;  %2355 = vmatprep.subr.mxu0 %v4102_v58 }
 0x176   : > { %1344 = vmatpush1.msra.mxu1 %v4108_v56  ;;  %2356 = vmatpush3.msra.mxu0 %v3331_v59  ;;  %v1179_v56 = vstv %s1178_s24  ;;  %s4173_s24 = sand.u32 1, %s2825_s9  }
 0x177   : > { %v2577_v57 = vpop.eup %2576  ;;  %1345 = vmatprep.subr.mxu1 %v4109_v3  ;;  %2357 = vmatprep.subr.mxu0 %v4102_v58  ;;  %v4128_v3 = vld [vmem:[#allocation73_spill] sm:$0xff]  ;;  %vm1180_vm3 = vcmp.eq.s32.totalorder %v1179_v56, 1  ;;  %v4154_v56 = vld [vmem:[#allocation36_spill] sm:$0xff]  ;;  %s3817_s21 = scalar_lea.sflag [#allocation6], %s4173_s24 }
 0x178   : > { %v1162_v45 = vmul.f32 %v2577_v57, %v1124_v54  ;;  %1346 = vmatpush1.msra.mxu1 %v4110_v40  ;;  %2358 = vmatpush3.msra.mxu0 %v3341_v9  ;;  %v4126_v54 = vld [vmem:[#allocation70_spill] sm:$0xff]  ;;  %v4129_v40 = vld [vmem:[#allocation75_spill] sm:$0xff] }
 0x179   : > { %1347 = vmatprep.subr.mxu1 %v4111_v27  ;;  %2359 = vmatprep.subr.mxu0 %v4102_v58  ;;  %v4130_v27 = vld [vmem:[#allocation76_spill] sm:$0xff] }
 0x17a   : > { %v1163_v39 = vadd.f32 %v1162_v45, %v684_v33  ;;  %1348 = vmatpush1.msra.mxu1 %v4112_v0  ;;  %2360 = vmatpush3.msra.mxu0 %v3351_v60  ;;  %v2579_v46 = vpop.eup %2578  ;;  %v4131_v0 = vld [vmem:[#allocation77_spill] sm:$0xff] }
 0x17b   : > { %1349 = vmatprep.subr.mxu1 %v4113_v49  ;;  %2361 = vmatprep.subr.mxu0 %v4102_v58  ;;  %v1165_v18 = vsub.f32 1.0, %v2579_v46  ;;  %v1167_v45 = vmul.f32 %v2579_v46, %v3348_v13  ;;  %v4148_v46 = vld [vmem:[#allocation32_spill] sm:$0xff] }
 0x17c   : > { %2580 = vtanh.f32 %v1163_v39  ;;  %1350 = vmatpush1.msra.mxu1 %v4114_v6  ;;  %2362 = vmatpush3.msra.mxu0 %v3357_v63  ;;  %v2622_v6 = vld [vmem:[#allocation4 + $0x170] sm:$0xff] }
 0x17d   : > { %1351 = vmatprep.subr.mxu1 %v4115_v36  ;;  %2363 = vmatprep.subr.mxu0 %v4102_v58  ;;  %v2623_v36 = vld [vmem:[#allocation4 + $0x168] sm:$0xff] }
 0x17e   : > { %1352 = vmatpush1.msra.mxu1 %v4116_v1  ;;  %2364 = vmatpush3.msra.mxu0 %v3362_v5  ;;  %v2625_v1 = vld [vmem:[#allocation4 + $0x150] sm:$0xff] }
 0x17f   : > { %1353 = vmatprep.subr.mxu1 %v4117_v34  ;;  %2365 = vmatprep.subr.mxu0 %v4102_v58  ;;  %v2626_v34 = vld [vmem:[#allocation4 + $0x140] sm:$0xff] }
 0x180   : > { %1354 = vmatpush1.msra.mxu1 %v4118_v55  ;;  %2366 = vmatpush3.msra.mxu0 %v3369_v62  ;;  %v2627_v55 = vld [vmem:[#allocation4 + $0x138] sm:$0xff] }
 0x181   : > { %1355 = vmatprep.subr.mxu1 %v4120_v28  ;;  %2367 = vmatprep.subr.mxu0 %v4102_v58  ;;  %v2628_v28 = vld [vmem:[#allocation4 + $0x128] sm:$0xff] }
 0x182   : > { %1356 = vmatpush1.msra.mxu1 %v4121_v31  ;;  %2368 = vmatpush3.msra.mxu0 %v3375_v8  ;;  %v4145_v31 = vld [vmem:[#allocation30_spill] sm:$0xff] }
 0x183   : > { %1357 = vmatprep.subr.mxu1 %v4122_v48  ;;  %2369 = vmatprep.subr.mxu0 %v4102_v58  ;;  %v4146_v48 = vld [vmem:[#allocation31_spill] sm:$0xff] }
 0x184   : > { %1358 = vmatpush1.msra.mxu1 %v4123_v51  ;;  %2370 = vmatpush3.msra.mxu0 %v3381_v7  ;;  %v4147_v51 = vld [vmem:[#allocation51_spill] sm:$0xff] }
 0x185   : > { %1359 = vmatprep.subr.mxu1 %v4124_v2  ;;  %2371 = vmatprep.subr.mxu0 %v4102_v58  ;;  %v4149_v2 = vld [vmem:[#allocation33_spill] sm:$0xff] }
 0x186   : > { %1360 = vmatpush1.msra.mxu1 %v4125_v61  ;;  %2372 = vmatpush3.msra.mxu0 %v3387_v11  ;;  %v4150_v61 = vld [vmem:[#allocation54_spill] sm:$0xff] }
 0x187   : > { %1361 = vmatprep.subr.mxu1 %v4126_v54  ;;  %2373 = vmatprep.subr.mxu0 %v4102_v58  ;;  %v4151_v54 = vld [vmem:[#allocation34_spill] sm:$0xff] }
 0x188   : > { %1362 = vmatpush1.msra.mxu1 %v4127_v22  ;;  %2374 = vmatpush3.msra.mxu0 %v3393_v12  ;;  %v4152_v22 = vld [vmem:[#allocation35_spill] sm:$0xff] }
 0x189   : > { %v2581_v57 = vpop.eup %2580  ;;  %1363 = vmatprep.subr.mxu1 %v4128_v3  ;;  %2375 = vmatprep.subr.mxu0 %v4102_v58  ;;  %v4156_v3 = vld [vmem:[#allocation60_spill] sm:$0xff] }
 0x18a   : > { %1364 = vmatpush1.msra.mxu1 %v3324_v19  ;;  %2376 = vmatpush3.msra.mxu0 %v3399_v14  ;;  %v1166_v33 = vmul.f32 %v2581_v57, %v1165_v18  ;;  %v4132_v19 = vld [vmem:[#allocation78_spill] sm:$0xff]  ;;  %v4153_v18 = vld [vmem:[#allocation57_spill] sm:$0xff] }
 0x18b   : > { %1365 = vmatprep.subr.mxu1 %v4129_v40  ;;  %2377 = vmatprep.subr.mxu0 %v4102_v58  ;;  %v4155_v57 = vld [vmem:[#allocation37_spill] sm:$0xff]  ;;  %v4159_v40 = vld [vmem:[#allocation64_spill] sm:$0xff] }
 0x18c   : > { %1366 = vmatpush1.msra.mxu1 %v4130_v27  ;;  %2378 = vmatpush3.msra.mxu0 %v3405_v15  ;;  %v1168_v39 = vadd.f32 %v1167_v45, %v1166_v33  ;;  %v4157_v33 = vld [vmem:[#allocation38_spill] sm:$0xff]  ;;  %v4158_v45 = vld [vmem:[#allocation39_spill] sm:$0xff]  ;;  %v4160_v27 = vld [vmem:[#allocation40_spill] sm:$0xff] }
 0x18d   : > { %1367 = vmatprep.subr.mxu1 %v4131_v0  ;;  %2379 = vmatprep.subr.mxu0 %v4102_v58 }
 0x18e   : > { %1368 = vmatpush1.msra.mxu1 %v4132_v19  ;;  %1401 = vmatprep.mubr.f32.mxu1 %v4102_v58  ;;  %v3650_v49 = vsel %vm1180_vm3, %v1168_v39, %v3348_v13  ;;  %v2624_v13 = vld [vmem:[#allocation4 + $0x158] sm:$0xff] }
 0x18f   : > { %2380 = vmatpush3.msra.mxu0 %v3411_v16  ;;  %2381 = vmatprep.mubr.msk.f32.mxu0 %vm2841_vm1, %v4102_v58  ;;  %2104 = vst [vmem:[%s3036_s15 + $0x10] sm:$0xff] %v3650_v49 }
 0x190   : > { %1402 = vmatmul.mubr.f32.vlgmr.msra.gmra.mxu1 %v3650_v49  ;;  %2382 = vmatmul.mubr.f32.vlgmr.msra.gmra.mxu0 %v3650_v49 }
 0x191   : > { %1546 = vmatprep.subr.mxu1 %v2622_v6  ;;  %2384 = vmatprep.subr.mxu0 %v4102_v58 }
 0x192   : > { %1547 = vmatpush1.msra.mxu1 %v2623_v36  ;;  %2385 = vmatpush3.msra.mxu0 %v3123_v32  ;;  %v2629_v32 = vld [vmem:[#allocation4 + $0x120] sm:$0xff] }
 0x193   : > { %1548 = vmatprep.subr.mxu1 %v2624_v13  ;;  %2386 = vmatprep.subr.mxu0 %v4102_v58  ;;  %v4161_v13 = vld [vmem:[#allocation84_spill] sm:$0xff] }
 0x194   : > { %1549 = vmatpush1.msra.mxu1 %v2625_v1  ;;  %2387 = vmatpush3.msra.mxu0 %v3132_v35  ;;  %v4136_v35 = vld [vmem:[#allocation24_spill] sm:$0xff] }
 0x195   : > { %1550 = vmatprep.subr.mxu1 %v2626_v34  ;;  %2388 = vmatprep.subr.mxu0 %v4102_v58 }
 0x196   : > { %1551 = vmatpush1.msra.mxu1 %v2627_v55  ;;  %2389 = vmatpush3.msra.mxu0 %v3142_v38  ;;  %v4139_v38 = vld [vmem:[#allocation26_spill] sm:$0xff] }
 0x197   : > { %1552 = vmatprep.subr.mxu1 %v2628_v28  ;;  %2390 = vmatprep.subr.mxu0 %v4102_v58  ;;  %v4162_v28 = vld [vmem:[#allocation86_spill] sm:$0xff] }
 0x198   : > { %1553 = vmatpush1.msra.mxu1 %v2629_v32  ;;  %2391 = vmatpush3.msra.mxu0 %v3152_v41  ;;  %v4141_v41 = vld [vmem:[#allocation45_spill] sm:$0xff] }
 0x199   : > { %1554 = vmatprep.subr.mxu1 %v3086_v20  ;;  %2392 = vmatprep.subr.mxu0 %v4102_v58  ;;  %v4133_v20 = vld [vmem:[#allocation22_spill] sm:$0xff] }
 0x19a   : > { %1555 = vmatpush1.msra.mxu1 %v3089_v21  ;;  %2393 = vmatpush3.msra.mxu0 %v3162_v44  ;;  %v4134_v21 = vld [vmem:[#allocation23_spill] sm:$0xff]  ;;  %v4142_v44 = vld [vmem:[#allocation28_spill] sm:$0xff] }
 0x19b   : > { %1556 = vmatprep.subr.mxu1 %v3093_v23  ;;  %2394 = vmatprep.subr.mxu0 %v4102_v58  ;;  %v4135_v23 = vld [vmem:[#allocation41_spill] sm:$0xff] }
 0x19c   : > { %1557 = vmatpush1.msra.mxu1 %v3096_v24  ;;  %2395 = vmatpush3.msra.mxu0 %v3172_v47  ;;  %v4137_v24 = vld [vmem:[#allocation25_spill] sm:$0xff] }
 0x19d   : > { %1558 = vmatprep.subr.mxu1 %v3100_v25  ;;  %2396 = vmatprep.subr.mxu0 %v4102_v58  ;;  %v4138_v25 = vld [vmem:[#allocation42_spill] sm:$0xff]  ;;  %v4143_v47 = vld [vmem:[#allocation29_spill] sm:$0xff] }
 0x19e   : > { %1559 = vmatpush1.msra.mxu1 %v3104_v26  ;;  %2397 = vmatpush3.msra.mxu0 %v3182_v50  ;;  %v4140_v26 = vld [vmem:[#allocation27_spill] sm:$0xff]  ;;  %v4144_v50 = vld [vmem:[#allocation48_spill] sm:$0xff] }
 0x19f   : > { %1560 = vmatprep.subr.mxu1 %v4133_v20  ;;  %2398 = vmatprep.subr.mxu0 %v4102_v58 }
 0x1a0   : > { %1561 = vmatpush1.msra.mxu1 %v4134_v21  ;;  %2399 = vmatpush3.msra.mxu0 %v4135_v23 }
 0x1a1   : > { %1562 = vmatprep.subr.mxu1 %v4136_v35  ;;  %2400 = vmatprep.subr.mxu0 %v4102_v58 }
 0x1a2   : > { %1563 = vmatpush1.msra.mxu1 %v4137_v24  ;;  %2401 = vmatpush3.msra.mxu0 %v4138_v25 }
 0x1a3   : > { %1564 = vmatprep.subr.mxu1 %v4139_v38  ;;  %2402 = vmatprep.subr.mxu0 %v4102_v58 }
 0x1a4   : > { %1565 = vmatpush1.msra.mxu1 %v4140_v26  ;;  %2403 = vmatpush3.msra.mxu0 %v4141_v41 }
 0x1a5   : > { %1566 = vmatprep.subr.mxu1 %v4142_v44  ;;  %2404 = vmatprep.subr.mxu0 %v4102_v58 }
 0x1a6   : > { %1567 = vmatpush1.msra.mxu1 %v4143_v47  ;;  %2405 = vmatpush3.msra.mxu0 %v4144_v50 }
 0x1a7   : > { %1568 = vmatprep.subr.mxu1 %v4145_v31  ;;  %2406 = vmatprep.subr.mxu0 %v4102_v58  ;;  %v4163_v31 = vld [vmem:[#allocation83_spill] sm:$0xff] }
 0x1a8   : > { %1569 = vmatpush1.msra.mxu1 %v4146_v48  ;;  %2407 = vmatpush3.msra.mxu0 %v4147_v51 }
 0x1a9   : > { %1570 = vmatprep.subr.mxu1 %v4148_v46  ;;  %2408 = vmatprep.subr.mxu0 %v4102_v58 }
 0x1aa   : > { %1571 = vmatpush1.msra.mxu1 %v4149_v2  ;;  %2409 = vmatpush3.msra.mxu0 %v4150_v61  ;;  %v4164_v61 = vld [vmem:[#allocation80_spill] sm:$0xff] }
 0x1ab   : > { %1572 = vmatprep.subr.mxu1 %v4151_v54  ;;  %2410 = vmatprep.subr.mxu0 %v4102_v58 }
 0x1ac   : > { %1573 = vmatpush1.msra.mxu1 %v4152_v22  ;;  %2411 = vmatpush3.msra.mxu0 %v4153_v18  ;;  %v4165_v22 = vld [vmem:[#allocation85_spill] sm:$0xff] }
 0x1ad   : > { %1574 = vmatprep.subr.mxu1 %v4154_v56  ;;  %2412 = vmatprep.subr.mxu0 %v4102_v58 }
 0x1ae   : > { %1575 = vmatpush1.msra.mxu1 %v4155_v57  ;;  %2413 = vmatpush3.msra.mxu0 %v4156_v3 }
 0x1af   : > { %1576 = vmatprep.subr.mxu1 %v4157_v33  ;;  %2414 = vmatprep.subr.mxu0 %v4102_v58 }
 0x1b0   : > { %1577 = vmatpush1.msra.mxu1 %v4158_v45  ;;  %1610 = vmatprep.mubr.f32.mxu1 %v4102_v58  ;;  %v1524_v45 = vstv %s1523_s18  ;;  %s2687_s18 = scalar_lea.vmem %s3811_s13, 384 }
 0x1b1   : > { %2415 = vmatpush3.msra.mxu0 %v4159_v40  ;;  %2416 = vmatprep.mubr.msk.f32.mxu0 %vm2841_vm1, %v4102_v58  ;;  %vm1525_vm4 = vcmp.eq.s32.totalorder %v1524_v45, 1  ;;  %p2688_p3 = scmp.ne.s32.totalorder %s3811_s13, %s2687_s18 }
 0x1b2   : > { %1687 = vmatprep.subr.mxu1 %v4160_v27  ;;  %2419 = vmatprep.subr.mxu0 %v4102_v58 }
 0x1b3   : > { %p2689_p7 = pnand %p2688_p3, %p2953_p5 }
 0x1b5   : > { %p2690_p8 = pneg %p2689_p7 }
 0x22f   : > { %v1262_v39 = vpop.f32.mrf.mxu1  ;;  %v1333_v0 = vpop.f32.mrf.mxu0 }
 0x230   : > { %v1263_v19 = vadd.f32 %v1262_v39, %v3537_v29  ;;  %v1334_v41 = vadd.f32 %v1333_v0, %v3551_v17 }
 0x231   : > { %v1264_v6 = vpop.f32.mrf.mxu1  ;;  %v2348_v36 = vpop.f32.mrf.mxu0 }
 0x232   : > { %v1478_v1 = vadd.f32 %v1263_v19, %v4161_v13  ;;  %v1265_v55 = vadd.f32 %v1264_v6, %v3541_v37  ;;  %v2630_v36 = vld [vmem:[#allocation4 + $0x2e8] sm:$0xff]  ;;  %v2631_v13 = vld [vmem:[#allocation4 + $0x2d8] sm:$0xff] }
 0x234   : > { %v2105_v34 = vmul.f32 -1.442695, %v1478_v1  ;;  %v1485_v32 = vadd.f32 %v1265_v55, %v4162_v28  ;;  %v2634_v55 = vld [vmem:[#allocation4 + $0x2b8] sm:$0xff] }
 0x236   : > { %2582 = vpow2.f32 %v2105_v34  ;;  %v2106_v20 = vmul.f32 -1.442695, %v1485_v32  ;;  %v2632_v34 = vld [vmem:[#allocation4 + $0x2d0] sm:$0xff]  ;;  %v2635_v32 = vld [vmem:[#allocation4 + $0x2a8] sm:$0xff] }
 0x238   : > { %2584 = vpow2.f32 %v2106_v20 }
 0x243   : > { %v2583_v21 = vpop.eup %2582 }
 0x244   : > { %v1482_v23 = vadd.f32 1.0, %v2583_v21 }
 0x245   : > { %v2585_v35 = vpop.eup %2584 }
 0x246   : > { %2586 = vrcp.f32 %v1482_v23  ;;  %v1489_v24 = vadd.f32 1.0, %v2585_v35  ;;  %v2638_v23 = vld [vmem:[#allocation4 + $0x288] sm:$0xff]  ;;  %v2639_v35 = vld [vmem:[#allocation4 + $0x278] sm:$0xff] }
 0x248   : > { %2588 = vrcp.f32 %v1489_v24  ;;  %v2640_v24 = vld [vmem:[#allocation4 + $0x270] sm:$0xff] }
 0x250   : > { %v1403_v25 = vpop.f32.mrf.mxu1  ;;  %v1474_v38 = vpop.f32.mrf.mxu0 }
 0x251   : > { %v1404_v26 = vadd.f32 %v1403_v25, %v3548_v30  ;;  %v1475_v20 = vadd.f32 %v1474_v38, %v3576_v43  ;;  %v2641_v38 = vld [vmem:[#allocation4 + $0x260] sm:$0xff] }
 0x252   : > { %v1405_v44 = vpop.f32.mrf.mxu1  ;;  %v2383_v47 = vpop.f32.mrf.mxu0 }
 0x253   : > { %v2587_v50 = vpop.eup %2586  ;;  %v1499_v48 = vadd.f32 %v1404_v26, %v4163_v31  ;;  %v1406_v2 = vadd.f32 %v1405_v44, %v3554_v10  ;;  %v2642_v26 = vld [vmem:[#allocation4 + $0x258] sm:$0xff]  ;;  %v2646_v44 = vld [vmem:[#allocation4 + $0x228] sm:$0xff] }
 0x254   : > { %v1492_v51 = vmul.f32 %v2587_v50, %v1334_v41  ;;  %v2644_v41 = vld [vmem:[#allocation4 + $0x240] sm:$0xff]  ;;  %v2647_v47 = vld [vmem:[#allocation4 + $0x218] sm:$0xff] }
 0x255   : > { %v2107_v46 = vmul.f32 -1.442695, %v1499_v48  ;;  %v1506_v18 = vadd.f32 %v1406_v2, %v4165_v22  ;;  %v2589_v57 = vpop.eup %2588  ;;  %v2650_v50 = vld [vmem:[#allocation4 + $0x1f8] sm:$0xff]  ;;  %v2652_v48 = vld [vmem:[#allocation4 + $0x1e0] sm:$0xff]  ;;  %v1529_v2 = vstv %s1528_s29  ;;  %s2693_s29 = scalar_lea.vmem %s2692_s28, 768 }
 0x256   : > { %v1493_v54 = vadd.f32 %v1492_v51, %v4164_v61  ;;  %v1495_v33 = vsub.f32 1.0, %v2589_v57  ;;  %v1497_v0 = vmul.f32 %v2589_v57, %v3567_v42  ;;  %v2654_v51 = vld [vmem:[#allocation4 + $0x1c8] sm:$0xff]  ;;  %vm1530_vm5 = vcmp.eq.s32.totalorder %v1529_v2, 1  ;;  %p2695_p9 = scmp.lt.s32.totalorder %s2693_s29, %s2687_s18 }
 0x257   : > { %2590 = vpow2.f32 %v2107_v46  ;;  %v2108_v56 = vmul.f32 -1.442695, %v1506_v18 }
 0x258   : > { %2592 = vtanh.f32 %v1493_v54  ;;  %v2656_v54 = vld [vmem:[#allocation4 + $0x1b0] sm:$0xff]  ;;  %p2696_p10 = por %p2695_p9, %p2694_p4 }
 0x259   : > { %2594 = vpow2.f32 %v2108_v56  ;;  %v2659_v56 = vld [vmem:[#allocation4 + $0x188] sm:$0xff] }
 0x25a   : > { %p2697_p2 = pnand %p2696_p10, %p2690_p8 }
 0x264   : > { %v2591_v3 = vpop.eup %2590 }
 0x265   : > { %v2593_v40 = vpop.eup %2592  ;;  %v1503_v27 = vadd.f32 1.0, %v2591_v3  ;;  %v2660_v3 = vld [vmem:[#allocation4 + $0x180] sm:$0xff] }
 0x266   : > { %v1496_v39 = vmul.f32 %v2593_v40, %v1495_v33  ;;  %v2595_v1 = vpop.eup %2594 }
 0x267   : > { %2596 = vrcp.f32 %v1503_v27  ;;  %v1510_v28 = vadd.f32 1.0, %v2595_v1 }
 0x268   : > { %v1498_v19 = vadd.f32 %v1497_v0, %v1496_v39  ;;  %v4168_v39 = vld [vmem:[#allocation87_spill] sm:$0xff] }
 0x269   : > { %2598 = vrcp.f32 %v1510_v28 }
 0x26a   : > { %v3733_v6 = vsel %vm1525_vm4, %v1498_v19, %v3567_v42  ;;  %v2633_v42 = vld [vmem:[#allocation4 + $0x2c0] sm:$0xff] }
 0x26b   : > { %2109 = vst [vmem:[%s3034_s14 + $0x8] sm:$0xff] %v3733_v6  ;;  %1611 = vmatmul.mubr.f32.vlgmr.msra.gmra.mxu1 %v3733_v6  ;;  %2417 = vmatmul.mubr.f32.vlgmr.msra.gmra.mxu0 %v3733_v6 }
 0x26c   : > { %1688 = vmatpush1.msra.mxu1 %v2630_v36  ;;  %2420 = vmatpush3.msra.mxu0 %v3301_v4  ;;  %v2636_v4 = vld [vmem:[#allocation4 + $0x2a0] sm:$0xff] }
 0x26d   : > { %1689 = vmatprep.subr.mxu1 %v2631_v13  ;;  %2421 = vmatprep.subr.mxu0 %v4102_v58 }
 0x26e   : > { %1690 = vmatpush1.msra.mxu1 %v2632_v34  ;;  %2422 = vmatpush3.msra.mxu0 %v4103_v52  ;;  %v2637_v52 = vld [vmem:[#allocation4 + $0x290] sm:$0xff] }
 0x26f   : > { %1691 = vmatprep.subr.mxu1 %v2633_v42  ;;  %2423 = vmatprep.subr.mxu0 %v4102_v58 }
 0x270   : > { %1692 = vmatpush1.msra.mxu1 %v2634_v55  ;;  %2424 = vmatpush3.msra.mxu0 %v4106_v53 }
 0x271   : > { %1693 = vmatprep.subr.mxu1 %v2635_v32  ;;  %2425 = vmatprep.subr.mxu0 %v4102_v58 }
 0x272   : > { %1694 = vmatpush1.msra.mxu1 %v2636_v4  ;;  %2426 = vmatpush3.msra.mxu0 %v3331_v59  ;;  %v4166_v59 = vld [vmem:[#allocation90_spill] sm:$0xff] }
 0x273   : > { %1695 = vmatprep.subr.mxu1 %v2637_v52  ;;  %2427 = vmatprep.subr.mxu0 %v4102_v58  ;;  %v4170_v52 = vld [vmem:[#allocation81_spill] sm:$0xff] }
 0x274   : > { %v2597_v21 = vpop.eup %2596  ;;  %1696 = vmatpush1.msra.mxu1 %v2638_v23  ;;  %2428 = vmatpush3.msra.mxu0 %v3341_v9  ;;  %v2643_v9 = vld [vmem:[#allocation4 + $0x248] sm:$0xff] }
 0x275   : > { %v1513_v53 = vmul.f32 %v2597_v21, %v1475_v20  ;;  %1697 = vmatprep.subr.mxu1 %v2639_v35  ;;  %2429 = vmatprep.subr.mxu0 %v4102_v58 }
 0x276   : > { %1698 = vmatpush1.msra.mxu1 %v2640_v24  ;;  %2430 = vmatpush3.msra.mxu0 %v3351_v60  ;;  %v2645_v60 = vld [vmem:[#allocation4 + $0x230] sm:$0xff]  ;;  %v2599_v31 = vpop.eup %2598  ;;  %v4171_v24 = vld [vmem:[#allocation79_spill] sm:$0xff] }
 0x277   : > { %v1514_v25 = vadd.f32 %v1513_v53, %v4166_v59  ;;  %1699 = vmatprep.subr.mxu1 %v2641_v38  ;;  %2431 = vmatprep.subr.mxu0 %v4102_v58  ;;  %v1516_v46 = vsub.f32 1.0, %v2599_v31  ;;  %v1518_v18 = vmul.f32 %v2599_v31, %v3650_v49 }
 0x278   : > { %1700 = vmatpush1.msra.mxu1 %v2642_v26  ;;  %2432 = vmatpush3.msra.mxu0 %v3357_v63  ;;  %v2648_v63 = vld [vmem:[#allocation4 + $0x210] sm:$0xff] }
 0x279   : > { %2600 = vtanh.f32 %v1514_v25  ;;  %1701 = vmatprep.subr.mxu1 %v2643_v9  ;;  %2433 = vmatprep.subr.mxu0 %v4102_v58  ;;  %v4172_v25 = vld [vmem:[#allocation82_spill] sm:$0xff] }
 0x27a   : > { %1702 = vmatpush1.msra.mxu1 %v2644_v41  ;;  %2434 = vmatpush3.msra.mxu0 %v3362_v5  ;;  %v2649_v5 = vld [vmem:[#allocation4 + $0x200] sm:$0xff]  ;;  %v1873_v41 = vstv %s1872_s10 }
 0x27b   : > { %1703 = vmatprep.subr.mxu1 %v2645_v60  ;;  %2435 = vmatprep.subr.mxu0 %v4102_v58  ;;  %vm1874_vm6 = vcmp.eq.s32.totalorder %v1873_v41, 1 }
 0x27c   : > { %1704 = vmatpush1.msra.mxu1 %v2646_v44  ;;  %2436 = vmatpush3.msra.mxu0 %v3369_v62  ;;  %v2651_v62 = vld [vmem:[#allocation4 + $0x1e8] sm:$0xff] }
 0x27d   : > { %1705 = vmatprep.subr.mxu1 %v2647_v47  ;;  %2437 = vmatprep.subr.mxu0 %v4102_v58 }
 0x27e   : > { %1706 = vmatpush1.msra.mxu1 %v2648_v63  ;;  %2438 = vmatpush3.msra.mxu0 %v3375_v8  ;;  %v2653_v8 = vld [vmem:[#allocation4 + $0x1d0] sm:$0xff] }
 0x27f   : > { %1707 = vmatprep.subr.mxu1 %v2649_v5  ;;  %2439 = vmatprep.subr.mxu0 %v4102_v58 }
 0x280   : > { %1708 = vmatpush1.msra.mxu1 %v2650_v50  ;;  %2440 = vmatpush3.msra.mxu0 %v3381_v7  ;;  %v2655_v7 = vld [vmem:[#allocation4 + $0x1b8] sm:$0xff] }
 0x281   : > { %1709 = vmatprep.subr.mxu1 %v2651_v62  ;;  %2441 = vmatprep.subr.mxu0 %v4102_v58 }
 0x282   : > { %1710 = vmatpush1.msra.mxu1 %v2652_v48  ;;  %2442 = vmatpush3.msra.mxu0 %v3387_v11  ;;  %v2657_v11 = vld [vmem:[#allocation4 + $0x1a0] sm:$0xff] }
 0x283   : > { %1711 = vmatprep.subr.mxu1 %v2653_v8  ;;  %2443 = vmatprep.subr.mxu0 %v4102_v58 }
 0x284   : > { %1712 = vmatpush1.msra.mxu1 %v2654_v51  ;;  %2444 = vmatpush3.msra.mxu0 %v3393_v12  ;;  %v2658_v12 = vld [vmem:[#allocation4 + $0x198] sm:$0xff] }
 0x285   : > { %1713 = vmatprep.subr.mxu1 %v2655_v7  ;;  %2445 = vmatprep.subr.mxu0 %v4102_v58 }
 0x286   : > { %v2601_v61 = vpop.eup %2600  ;;  %1714 = vmatpush1.msra.mxu1 %v2656_v54  ;;  %2446 = vmatpush3.msra.mxu0 %v3399_v14 }
 0x287   : > { %1715 = vmatprep.subr.mxu1 %v2657_v11  ;;  %2447 = vmatprep.subr.mxu0 %v4102_v58  ;;  %v1517_v22 = vmul.f32 %v2601_v61, %v1516_v46 }
 0x288   : > { %1716 = vmatpush1.msra.mxu1 %v2658_v12  ;;  %2448 = vmatpush3.msra.mxu0 %v3405_v15 }
 0x289   : > { %1717 = vmatprep.subr.mxu1 %v2659_v56  ;;  %2449 = vmatprep.subr.mxu0 %v4102_v58  ;;  %v1519_v57 = vadd.f32 %v1518_v18, %v1517_v22 }
 0x28a   : > { %1718 = vmatpush1.msra.mxu1 %v2660_v3  ;;  %1751 = vmatprep.mubr.f32.mxu1 %v4102_v58 }
 0x28b   : > { %2450 = vmatpush3.msra.mxu0 %v3411_v16  ;;  %2451 = vmatprep.mubr.msk.f32.mxu0 %vm2841_vm1, %v4102_v58  ;;  %v3784_v14 = vsel %vm1530_vm5, %v1519_v57, %v3650_v49  ;;  %v4169_v49 = vld [vmem:[#allocation88_spill] sm:$0xff] }
 0x28c   : > { %2110 = vst [vmem:[%s3036_s15 + $0x8] sm:$0xff] %v3784_v14  ;;  %1752 = vmatmul.mubr.f32.vlgmr.msra.gmra.mxu1 %v3784_v14  ;;  %2452 = vmatmul.mubr.f32.vlgmr.msra.gmra.mxu0 %v3784_v14 }
 0x32b   : > { %v1612_v15 = vpop.f32.mrf.mxu1  ;;  %v1683_v33 = vpop.f32.mrf.mxu0 }
 0x32c   : > { %v1613_v45 = vadd.f32 %v1612_v15, %v3537_v29  ;;  %v1684_v32 = vadd.f32 %v1683_v33, %v3551_v17 }
 0x32d   : > { %v1614_v40 = vpop.f32.mrf.mxu1  ;;  %v2418_v27 = vpop.f32.mrf.mxu0 }
 0x32e   : > { %v1828_v16 = vadd.f32 %v1613_v45, %v4168_v39  ;;  %v1615_v58 = vadd.f32 %v1614_v40, %v3541_v37 }
 0x330   : > { %v2111_v0 = vmul.f32 -1.442695, %v1828_v16  ;;  %v1835_v19 = vadd.f32 %v1615_v58, %v4169_v49 }
 0x332   : > { %2602 = vpow2.f32 %v2111_v0  ;;  %v2112_v36 = vmul.f32 -1.442695, %v1835_v19 }
 0x334   : > { %2604 = vpow2.f32 %v2112_v36 }
 0x33f   : > { %v2603_v13 = vpop.eup %2602 }
 0x340   : > { %v1832_v1 = vadd.f32 1.0, %v2603_v13 }
 0x341   : > { %v2605_v34 = vpop.eup %2604 }
 0x342   : > { %2606 = vrcp.f32 %v1832_v1  ;;  %v1839_v42 = vadd.f32 1.0, %v2605_v34 }
 0x344   : > { %2608 = vrcp.f32 %v1839_v42 }
 0x34c   : > { %v1753_v55 = vpop.f32.mrf.mxu1  ;;  %v3794_v29 = vpop.f32.mrf.mxu0 }
 0x34d   : > { %v1754_v28 = vadd.f32 %v1753_v55, %v3548_v30 }
 0x34e   : > { %v1755_v4 = vpop.f32.mrf.mxu1  ;;  %v2453_v37 = vpop.f32.mrf.mxu0 }
 0x34f   : > { %v2607_v20 = vpop.eup %2606  ;;  %v1849_v21 = vadd.f32 %v1754_v28, %v4170_v52  ;;  %v1756_v35 = vadd.f32 %v1755_v4, %v3554_v10 }
 0x350   : > { %v1842_v23 = vmul.f32 %v2607_v20, %v1684_v32 }
 0x351   : > { %v2113_v53 = vmul.f32 -1.442695, %v1849_v21  ;;  %v1856_v30 = vadd.f32 %v1756_v35, %v4172_v25  ;;  %v2609_v38 = vpop.eup %2608 }
 0x352   : > { %v1843_v59 = vadd.f32 %v1842_v23, %v4171_v24  ;;  %v1845_v9 = vsub.f32 1.0, %v2609_v38  ;;  %v1847_v44 = vmul.f32 %v2609_v38, %v3733_v6 }
 0x353   : > { %2610 = vpow2.f32 %v2113_v53  ;;  %v2114_v17 = vmul.f32 -1.442695, %v1856_v30 }
 0x354   : > { %2612 = vtanh.f32 %v1843_v59 }
 0x355   : > { %2614 = vpow2.f32 %v2114_v17 }
 0x360   : > { %v2611_v26 = vpop.eup %2610 }
 0x361   : > { %v2613_v10 = vpop.eup %2612  ;;  %v1853_v60 = vadd.f32 1.0, %v2611_v26 }
 0x362   : > { %v1846_v47 = vmul.f32 %v2613_v10, %v1845_v9 }
 0x363   : > { %2616 = vrcp.f32 %v1853_v60 }
 0x364   : > { %v1848_v63 = vadd.f32 %v1847_v44, %v1846_v47 }
 0x366   : > { %v1875_v5 = vsel %vm1874_vm6, %v1848_v63, %v3733_v6 }
 0x367   : > { %2115 = vst [vmem:[%s3034_s14 + $0x10] sm:$0xff] %v1875_v5  ;;  %1884 = vst [vmem:[#allocation10] sm:$0xff] %v1875_v5 }
 0x368   : > { %2700 = shalt.err (!%p2697_p2)
}
 0x369   : > { %s2701_s14 = scalar_lea.hbm %s3809_s17, 384  ;;  %s2705_s27 = scalar_lea.hbm %s3942_s6, 1152 }
 0x36a   : > { %p2702_p11 = scmp.ne.s32.totalorder %s3809_s17, %s2701_s14  ;;  %p2706_p0 = scmp.lt.s32.totalorder %s3809_s17, %s3942_s6 }
 0x36b   : > { %p2707_p1 = scmp.lt.s32.totalorder %s2705_s27, %s2701_s14 }
 0x36c   : > { %p2703_p12 = pnand %p2702_p11, %p2953_p5 }
 0x36d   : > { %p2708_p3 = por %p2707_p1, %p2706_p0 }
 0x36e   : > { %p2704_p13 = pneg %p2703_p12 }
 0x370   : > { %p2709_p7 = pnand %p2708_p3, %p2704_p13 }
 0x372   : > { %2712 = shalt.err (!%p2709_p7)
}
 0x373   : > { %s2843_s24 = smov 128   ;;  %s2844_s18 = smov 8   ;;  %v2615_v6 = vpop.eup %2614  ;;  %v1825_v62 = vadd.f32 %v3794_v29, %v3576_v43  ;;  %v4174_v8 = vld [vmem:[#allocation89_spill] sm:$0xff] }
 0x374   : > { %2460 = dma.vmem_to_hbm [thread:$0]  (%p2953_p5), %s3811_s13, 384, %s3809_s17, %s3817_s21, %s2843_s24, %s2843_s24, %s2844_s18   ;;  %v1860_v50 = vadd.f32 1.0, %v2615_v6  ;;  %v2617_v31 = vpop.eup %2616 }
 0x375   : > { %v1863_v48 = vmul.f32 %v2617_v31, %v1825_v62  ;;  %s1877_s3 = scalar_select %p354_p6, 1, 0 }
 0x376   : > { %2618 = vrcp.f32 %v1860_v50  ;;  %s1891_s19 = sand.u32 1, %s2928_s12   ;;  %s4175_s13 = ssub.s32 2, %s2928_s12 }
 0x377   : > { %v1864_v51 = vadd.f32 %v1863_v48, %v4174_v8  ;;  %v1878_v2 = vstv %s1877_s3  ;;  %s2123_s17 = smul.u32 384, %s4175_s13  ;;  %s1922_s21 = sshll.u32 %s3036_s15, 4  ;;  %s3858_s21 = int_to_ptr.vmem [resolvable:$true] %s1922_s21 }
 0x378   : > { %vm1879_vm7 = vcmp.eq.s32.totalorder %v1878_v2, 1  ;;  %s2845_s28 = smov [#allocation10]   ;;  %s1892_s10 = scalar_lea.sflag [#allocation9], %s1891_s19 }
 0x379   : > { %2620 = vtanh.f32 %v1864_v51  ;;  %s1935_s29 = sshll.u32 %s2845_s28, 4  ;;  %s3856_s25 = scalar_lea.hbm %s3943_s7, %s2123_s17  ;;  %s3861_s29 = int_to_ptr.vmem [resolvable:$true] %s1935_s29 }
 0x37a   : > { %s2713_s27 = scalar_lea.vmem %s3858_s21, 384  ;;  %p4176_p6 = scmp.ne.s32.totalorder %s4027_s26, 0 }
 0x37b   : > { %p2714_p5 = scmp.ne.s32.totalorder %s3858_s21, %s2713_s27  ;;  %s2846_s16 = smov [#allocation8]  }
 0x37c   : > { %s2717_s22 = sshll.u32 %s2846_s16, 4  ;;  %s2718_s22 = int_to_ptr.vmem [resolvable:$false] %s2717_s22 }
 0x37d   : > { %p2715_p8 = pnand %p2714_p5, %p4176_p6  ;;  %s2719_s3 = scalar_lea.vmem %s2718_s22, 768 }
 0x37e   : > { %p2720_p9 = scmp.lt.s32.totalorder %s3858_s21, %s2718_s22  ;;  %p2721_p10 = scmp.lt.s32.totalorder %s2719_s3, %s2713_s27 }
 0x37f   : > { %p2716_p4 = pneg %p2715_p8 }
 0x380   : > { %p2722_p2 = por %p2721_p10, %p2720_p9 }
 0x382   : > { %p2723_p11 = pnand %p2722_p2, %p2716_p4 }
 0x383   : > { %v2619_v7 = vpop.eup %2618 }
 0x384   : > { %v1866_v46 = vsub.f32 1.0, %v2619_v7  ;;  %v1868_v54 = vmul.f32 %v2619_v7, %v3784_v14 }
 0x386   : > { %v2621_v61 = vpop.eup %2620 }
 0x387   : > { %v1867_v43 = vmul.f32 %v2621_v61, %v1866_v46 }
 0x389   : > { %v1869_v11 = vadd.f32 %v1868_v54, %v1867_v43 }
 0x38b   : > { %v1880_v22 = vsel %vm1879_vm7, %v1869_v11, %v3784_v14 }
 0x38c   : > { %1883 = vst [vmem:[%s3036_s15] sm:$0xff] %v1880_v22  ;;  %1885 = vst [vmem:[#allocation10 + $0x8] sm:$0xff] %v1880_v22 }
 0x38d   : > { %2726 = shalt.err (!%p2723_p11)
}
 0x38e   : > { %s2727_s15 = scalar_lea.hbm %s3856_s25, 384  ;;  %s2731_s17 = scalar_lea.hbm %s3943_s7, 1152 }
 0x38f   : > { %p2728_p12 = scmp.ne.s32.totalorder %s3856_s25, %s2727_s15  ;;  %p2732_p1 = scmp.lt.s32.totalorder %s3856_s25, %s3943_s7 }
 0x390   : > { %p2733_p3 = scmp.lt.s32.totalorder %s2731_s17, %s2727_s15 }
 0x391   : > { %p2729_p13 = pnand %p2728_p12, %p4176_p6 }
 0x392   : > { %p2734_p7 = por %p2733_p3, %p2732_p1 }
 0x393   : > { %p2730_p0 = pneg %p2729_p13 }
 0x395   : > { %p2735_p5 = pnand %p2734_p7, %p2730_p0 }
 0x397   : > { %2738 = shalt.err (!%p2735_p5)
}
 0x398   : > { %2461 = dma.vmem_to_hbm [thread:$0]  (%p4176_p6), %s3858_s21, 384, %s3856_s25, %s1892_s10, %s2843_s24, %s2843_s24, %s2844_s18  }
 0x399   : > { %s2739_s23 = scalar_lea.vmem %s3861_s29, 256  ;;  %p4177_p4 = scmp.eq.s32.totalorder %s2928_s12, 2 }
 0x39a   : > { %p2740_p8 = scmp.ne.s32.totalorder %s3861_s29, %s2739_s23  ;;  %p2746_p2 = scmp.lt.s32.totalorder %s3861_s29, %s3861_s29 }
 0x39b   : > { %p2747_p11 = scmp.lt.s32.totalorder %s2739_s23, %s2739_s23 }
 0x39c   : > { %p2741_p9 = pnand %p2740_p8, %p4177_p4 }
 0x39d   : > { %p2748_p12 = por %p2747_p11, %p2746_p2 }
 0x39e   : > { %p2742_p10 = pneg %p2741_p9 }
 0x3a0   : > { %p2749_p13 = pnand %p2748_p12, %p2742_p10 }
 0x3a2   : > { %2752 = shalt.err (!%p2749_p13)
}
 0x3a3   : > { %p4178_p0 = pmov %p4177_p4 }
 0x3a5   : > { %2463 = dma.vmem_to_hbm [thread:$0]  (%p4178_p0), %s3861_s29, 256, %s3944_s8, [#allocation9], %s2843_s24, %s2843_s24, %s2844_s18  }
 0x3a6   : > { %p4179_p6 = pmov %p4178_p0 }
 0x3a7   : > { %p4180_p1 = pmov %p4178_p0 }
 0x3a8   : > { %2796 = dma.done.wait (%p4179_p6), [#allocation9], 256  }
 0x3a9   : > { %2798 = vsyncadd (%p4180_p1), [#allocation9], 4294967040 }
 0x3aa PF: > { %p2483_p3 = scmp.ge.s32.totalorder %s2833_s11, 2  ;;  %s1954_s21 = sand.u32 1, %s2821_s30  }
 0x3ab   : > { %p4181_p7 = scmp.ne.s32.totalorder %s4025_s20, 0  ;;  %s1955_s25 = scalar_lea.sflag [#allocation6], %s1954_s21 }
 0x3ad   : > { %p2473_p5 = pnand %p2483_p3, %p4181_p7 }
 0x3af   : > { %p2474_p8 = pneg %p2473_p5 }
 0x3b1   : > { %2800 = dma.done.wait (%p2474_p8), %s1955_s25, 384  }
 0x3b2   : > { %2802 = vsyncadd (%p2474_p8), %s1955_s25, 4294966912  ;;  %s4182_s10 = sadd.s32 4294967294, %s2833_s11   ;;  %s4183_s24 = sld [smem:[#allocation21_spill]] }
 0x3b3   : > { %s1963_s18 = sand.u32 1, %s4182_s10  }
 0x3b4   : > { %s1964_s12 = scalar_lea.sflag [#allocation9], %s1963_s18 }
 0x3b8   : > { %p4184_p4 = scmp.ne.s32.totalorder %s4183_s24, 0 }
 0x3ba   : > { %p2476_p9 = pnand %p2483_p3, %p4184_p4 }
 0x3bc   : > { %p2477_p10 = pneg %p2476_p9 }
 0x3be   : > { %2804 = dma.done.wait (%p2477_p10), %s1964_s12, 384  }
 0x3bf   : > { %2806 = vsyncadd (%p2477_p10), %s1964_s12, 4294966912  ;;  %s4185_s11 = sld [smem:[#allocation18_spill]]  ;;  %s4191_s30 = smov %s2825_s9 }
 0x3c0   : > { %s4186_s27 = sld [smem:[#allocation15_spill]] }
 0x3c1   : > { %s4187_s28 = sld [smem:[#allocation16_spill]] }
 0x3c2   : > { %s4188_s29 = sld [smem:[#allocation20_spill]] }
 0x3c3   : > { %s4189_s20 = sld [smem:[#allocation17_spill]] }
 0x3c4   : > { %s4190_s10 = sld [smem:[#allocation19_spill]] }
 0x3c5   : > { %p23_p2 = scmp.ge.s32.totalorder %s4185_s11, 5  }
 0x3c7   :  { %25 = sbr.rel (!%p23_p2) target bundleno = 10 (0xa), region = 131 }
 0x3c9   : > { %s4192_s9 = smov %s4189_s20 }
 0x3cc   :  { %1969 = vsyncpa [#allocation5], 1 }
 0x3cd   :  { %1971 = vsyncpa [#allocation5 + $0x1], 1 }
 0x3ce   :  { %1972 = vsyncpa [#allocation6], 1 }
 0x3cf   :  { %1974 = vsyncpa [#allocation6 + $0x1], 1 }
 0x3d0   :  { %1975 = vsyncpa [#allocation9], 1 }
 0x3d1   :  { %1977 = vsyncpa [#allocation9 + $0x1], 1 }

</bundles_post_ra>
